<compile_context>
chip_gen: v6e
topology: v6e:2x2x1
jax: 0.10.0
libtpu: 0.0.40
codegen_flags: <defaults>
</compile_context>

<pallas_src>
import jax
import jax.numpy as jnp
from jax.experimental import pallas as pl
from jax.experimental.pallas import tpu as pltpu


# ------------------------------ fused kernel ------------------------------- #

def _make_fused_kernel(cfg):
    B = cfg["block_batch"]
    L, c_in = cfg["length"], cfg["c_in"]
    l1, l2, l3, l4 = cfg["lens"]
    c1, c3, c4p = cfg["c1"], cfg["c3"], cfg["c4_pad"]
    stage = cfg["stage"]          # x arrives narrow (bf16): upcast once to f32
    mxu_dtype = cfg["mxu_dtype"]  # dtype fed to the MXU (bf16 on v6e/v7x)

    def build_im2col(src, dst, l_in, l_out, ksize, stride, c):
        """dst[b*l_out:(b+1)*l_out, k*c:(k+1)*c] <- rows (k + stride*j) of sample b."""
        for b in range(B):                      # static unroll: B, K are tiny
            for k in range(ksize):
                r0 = b * l_in + k               # static start; stays in sample b
                if stride == 1:
                    rows = src[r0:r0 + l_out, :]
                else:
                    rows = src[pl.ds(r0, l_out, stride=stride), :]
                dst[b * l_out:(b + 1) * l_out, k * c:(k + 1) * c] = rows

    def dense_relu(im_ref, w_ref, b_ref):
        # One deep MXU matmul per layer: (B*l_out, K*C_in) @ (K*C_in, C_out).
        acc = jnp.dot(im_ref[...].astype(mxu_dtype), w_ref[...],
                      preferred_element_type=jnp.float32)
        return jnp.maximum(acc + b_ref[...], 0.0)

    def kernel(x_ref, w1, b1, w2, b2, w3, b3, w4, b4, o_ref, *scratch):
        if stage:
            x32 = scratch[0]
            scratch = scratch[1:]
            x32[...] = x_ref[...].astype(jnp.float32)   # one upcast pass
            src0 = x32                                   # strided reads on f32
        else:
            src0 = x_ref                                 # no staging copy

        im1, a1, im2, a2, im3, a3, im4 = scratch

        build_im2col(src0, im1, L, l1, 5, 2, c_in)
        a1[...] = dense_relu(im1, w1, b1)                # (B*l1, c1)

        build_im2col(a1, im2, l1, l2, 3, 1, c1)
        a2[...] = dense_relu(im2, w2, b2)                # (B*l2, c1)

        build_im2col(a2, im3, l2, l3, 3, 2, c1)
        a3[...] = dense_relu(im3, w3, b3)                # (B*l3, c3)

        build_im2col(a3, im4, l3, l4, 3, 2, c3)
        h4 = dense_relu(im4, w4, b4)                     # (B*l4, c4_pad)

        # AdaptiveMaxPool1d(1): per-sample global max over the length axis.
        for b in range(B):
            o_ref[b:b + 1, :] = jnp.max(h4[b * l4:(b + 1) * l4, :],
                                        axis=0, keepdims=True)

    return kernel


# ------------------------------- JAX wrapper -------------------------------- #

def _prep_w(w, c_out_pad=None):
    """torch Conv1d weight (C_out, C_in, K) -> im2col weight (K*C_in, C_out[_pad])."""
    c_out, c_in, k = w.shape
    w = jnp.transpose(w, (2, 1, 0)).reshape(k * c_in, c_out)
    if c_out_pad is not None and c_out_pad > c_out:
        w = jnp.pad(w, ((0, 0), (0, c_out_pad - c_out)))
    return w


def conv_overall_blk_forward(x_ncl, params, *, block_batch=2,
                             compute_dtype=jnp.float32):
    """x_ncl: (N, C_in, L) like the PyTorch module. Returns (N, 4*num_channels).

    compute_dtype=jnp.bfloat16 halves the HBM x/weight streams and feeds the
    bf16 MXU (recommended on v6e/v7x); accumulation/bias/ReLU/max stay f32.
    """
    (w1, b1), (w2, b2), (w3, b3), (w4, b4) = params
    n, c_in, length = x_ncl.shape

    # Static output length of each VALID conv.
    l1 = (length - 5) // 2 + 1
    l2 = l1 - 2
    l3 = (l2 - 3) // 2 + 1
    l4 = (l3 - 3) // 2 + 1
    assert l4 >= 1, "input length too short for the 4-layer conv stack"

    c1 = w1.shape[0]                     # num_channels
    c3 = w3.shape[0]                     # 2 * num_channels
    c4 = w4.shape[0]                     # 4 * num_channels
    c4_pad = ((c4 + 127) // 128) * 128   # lane-dense final layer / output

    # Batch blocking: bb samples per grid step, batch folded into the matmul M.
    bb = max(1, min(block_batch, n))
    n_pad = pl.cdiv(n, bb) * bb
    x = jnp.transpose(x_ncl, (0, 2, 1))                  # (N, L, C_in)
    if n_pad != n:
        x = jnp.pad(x, ((0, n_pad - n), (0, 0), (0, 0)))
    x = x.reshape(n_pad // bb, bb * length, c_in).astype(compute_dtype)

    w1t = _prep_w(w1).astype(compute_dtype)
    w2t = _prep_w(w2).astype(compute_dtype)
    w3t = _prep_w(w3).astype(compute_dtype)
    w4t = _prep_w(w4, c4_pad).astype(compute_dtype)
    b1r = b1.reshape(1, -1).astype(jnp.float32)
    b2r = b2.reshape(1, -1).astype(jnp.float32)
    b3r = b3.reshape(1, -1).astype(jnp.float32)
    b4r = jnp.pad(b4, (0, c4_pad - c4)).reshape(1, -1).astype(jnp.float32)

    stage = jnp.dtype(compute_dtype) != jnp.dtype(jnp.float32)
    kernel = _make_fused_kernel(dict(
        block_batch=bb, length=length, c_in=c_in, lens=(l1, l2, l3, l4),
        c1=c1, c3=c3, c4_pad=c4_pad, stage=stage, mxu_dtype=compute_dtype))

    # VMEM scratch: optional f32 staging + 4x (im2col slab, activation).
    scratch_defs = ([(bb * length, c_in)] if stage else []) + [
        (bb * l1, 5 * c_in), (bb * l1, c1),
        (bb * l2, 3 * c1),   (bb * l2, c1),
        (bb * l3, 3 * c1),   (bb * l3, c3),
        (bb * l4, 3 * c3),
    ]
    scratch_shapes = [pltpu.VMEM(s, jnp.float32) for s in scratch_defs]

    # Scoped-VMEM budget: scratch + double-buffered in/out blocks + weights.
    in_item = jnp.dtype(compute_dtype).itemsize
    scratch_bytes = sum(4 * r * c for (r, c) in scratch_defs)
    blk_bytes = bb * length * c_in * in_item + bb * c4_pad * 4
    w_bytes = (sum(int(w.size) * in_item for w in (w1t, w2t, w3t, w4t))
               + sum(int(b.size) * 4 for b in (b1r, b2r, b3r, b4r)))
    vmem_need = scratch_bytes + 2 * (blk_bytes + w_bytes) + (2 << 20)
    vmem_limit = int(min(48 << 20, max(32 << 20, vmem_need)))

    def full2d(a):
        return pl.BlockSpec(a.shape, lambda i: (0, 0))

    out = pl.pallas_call(
        kernel,
        out_shape=jax.ShapeDtypeStruct((n_pad // bb, bb, c4_pad), jnp.float32),
        grid=(n_pad // bb,),
        in_specs=[
            pl.BlockSpec((pl.Squeezed(), bb * length, c_in),
                         lambda i: (i, 0, 0)),
            full2d(w1t), full2d(b1r),
            full2d(w2t), full2d(b2r),
            full2d(w3t), full2d(b3r),
            full2d(w4t), full2d(b4r),
        ],
        out_specs=pl.BlockSpec((pl.Squeezed(), bb, c4_pad),
                               lambda i: (i, 0, 0)),
        scratch_shapes=scratch_shapes,
        compiler_params=pltpu.CompilerParams(
            dimension_semantics=("parallel",),        # batch blocks across TCs
            vmem_limit_bytes=vmem_limit),
    )(x, w1t, b1r, w2t, b2r, w3t, b3r, w4t, b4r)

    return out.reshape(n_pad, c4_pad)[:n, :c4]        # Flatten()


# -------------------------- parameter initialization ----------------------- #

def init_params(key, input_channels, num_channels):
    """Deterministic init matching torch Conv1d default shapes (uniform +-1/sqrt(fan_in))."""
    ks = jax.random.split(key, 8)

    def u(k, shape, fan_in):
        bound = 1.0 / (fan_in ** 0.5)
        return jax.random.uniform(k, shape, jnp.float32, -bound, bound)

    c1 = num_channels
    c3 = num_channels * 2
    c4 = num_channels * 4
    w1 = u(ks[0], (c1, input_channels, 5), input_channels * 5)
    b1 = u(ks[1], (c1,), input_channels * 5)
    w2 = u(ks[2], (c1, c1, 3), c1 * 3)
    b2 = u(ks[3], (c1,), c1 * 3)
    w3 = u(ks[4], (c3, c1, 3), c1 * 3)
    b3 = u(ks[5], (c3,), c1 * 3)
    w4 = u(ks[6], (c4, c3, 3), c3 * 3)
    b4 = u(ks[7], (c4,), c3 * 3)
    return (w1, b1), (w2, b2), (w3, b3), (w4, b4)


# ------------------------------- reference --------------------------------- #

def reference_forward(x_ncl, params):
    """Pure-JAX (XLA) reference with identical semantics to the PyTorch module."""
    (w1, b1), (w2, b2), (w3, b3), (w4, b4) = params
    dn = ('NCH', 'OIH', 'NCH')

    def conv(x, w, b, s):
        y = jax.lax.conv_general_dilated(x, w, (s,), 'VALID',
                                         dimension_numbers=dn,
                                         precision=jax.lax.Precision.HIGHEST)
        return jax.nn.relu(y + b[None, :, None])

    y = conv(x_ncl, w1, b1, 2)
    y = conv(y, w2, b2, 1)
    y = conv(y, w3, b3, 2)
    y = conv(y, w4, b4, 2)
    return jnp.max(y, axis=-1)        # AdaptiveMaxPool1d(1) + Flatten


# ---------------------------------- main ------------------------------------ #

if __name__ == "__main__":
    key = jax.random.PRNGKey(0)
    kx, kp = jax.random.split(key)

    N, C_in, L = 4, 4, 64             # NCL, like the torch module
    num_channels = 32                 # c4 = 128 -> lane-dense final layer

    x = jax.random.normal(kx, (N, C_in, L), jnp.float32)
    params = init_params(kp, C_in, num_channels)
    ref = reference_forward(x, params)

    # f32 path (tight numerical check).
    fwd_f32 = jax.jit(lambda a: conv_overall_blk_forward(
        a, params, block_batch=2, compute_dtype=jnp.float32))
    out_f32 = jax.block_until_ready(fwd_f32(x))
    assert out_f32.shape == (N, 4 * num_channels), out_f32.shape
    assert jnp.allclose(out_f32, ref, atol=1e-4, rtol=1e-4), \
        float(jnp.max(jnp.abs(out_f32 - ref)))

    # bf16 inputs/weights (v6e/v7x recommendation) -- loosened tolerance.
    fwd_bf16 = jax.jit(lambda a: conv_overall_blk_forward(
        a, params, block_batch=2, compute_dtype=jnp.bfloat16))
    out_bf16 = jax.block_until_ready(fwd_bf16(x))
    assert out_bf16.shape == (N, 4 * num_channels), out_bf16.shape
    assert jnp.allclose(out_bf16, ref, atol=5e-2, rtol=5e-2), \
        float(jnp.max(jnp.abs(out_bf16 - ref)))

    print("KERNEL_OK")
</pallas_src>

<mosaic_0001>
module attributes {stable_mosaic.version = 11 : i64} {
  func.func @kernel(%arg0: i32, %arg1: memref<1x128x4xf32, #tpu.memory_space<vmem>>, %arg2: memref<20x32xf32, #tpu.memory_space<vmem>>, %arg3: memref<1x32xf32, #tpu.memory_space<vmem>>, %arg4: memref<96x32xf32, #tpu.memory_space<vmem>>, %arg5: memref<1x32xf32, #tpu.memory_space<vmem>>, %arg6: memref<96x64xf32, #tpu.memory_space<vmem>>, %arg7: memref<1x64xf32, #tpu.memory_space<vmem>>, %arg8: memref<192x128xf32, #tpu.memory_space<vmem>>, %arg9: memref<1x128xf32, #tpu.memory_space<vmem>>, %arg10: memref<1x2x128xf32, #tpu.memory_space<vmem>>, %arg11: memref<60x20xf32, #tpu.memory_space<vmem>>, %arg12: memref<60x32xf32, #tpu.memory_space<vmem>>, %arg13: memref<56x96xf32, #tpu.memory_space<vmem>>, %arg14: memref<56x32xf32, #tpu.memory_space<vmem>>, %arg15: memref<26x96xf32, #tpu.memory_space<vmem>>, %arg16: memref<26x64xf32, #tpu.memory_space<vmem>>, %arg17: memref<12x192xf32, #tpu.memory_space<vmem>>) attributes {dimension_semantics = [#tpu.dimension_semantics<parallel>], iteration_bounds = array<i64: 2>, scalar_prefetch = 0 : i64, scratch_operands = 7 : i64, tpu.core_type = #tpu.core_type<tc>, window_params = [{transform_indices = @transform_0, window_bounds = array<i64: 1, 128, 4>}, {pipeline_mode = #tpu.pipeline_mode<synchronous>, transform_indices = @transform_1, window_bounds = array<i64: 20, 32>}, {pipeline_mode = #tpu.pipeline_mode<synchronous>, transform_indices = @transform_2, window_bounds = array<i64: 1, 32>}, {pipeline_mode = #tpu.pipeline_mode<synchronous>, transform_indices = @transform_3, window_bounds = array<i64: 96, 32>}, {pipeline_mode = #tpu.pipeline_mode<synchronous>, transform_indices = @transform_4, window_bounds = array<i64: 1, 32>}, {pipeline_mode = #tpu.pipeline_mode<synchronous>, transform_indices = @transform_5, window_bounds = array<i64: 96, 64>}, {pipeline_mode = #tpu.pipeline_mode<synchronous>, transform_indices = @transform_6, window_bounds = array<i64: 1, 64>}, {pipeline_mode = #tpu.pipeline_mode<synchronous>, transform_indices = @transform_7, window_bounds = array<i64: 192, 128>}, {pipeline_mode = #tpu.pipeline_mode<synchronous>, transform_indices = @transform_8, window_bounds = array<i64: 1, 128>}, {transform_indices = @transform_9, window_bounds = array<i64: 1, 2, 128>}]} {
    %c0 = arith.constant 0 : index
    %c0_0 = arith.constant 0 : index
    %c0_1 = arith.constant 0 : index
    %0 = tpu.strided_load %arg1[%c0, %c0_0, %c0_1] {strides = array<i32: 1, 2, 1>} : memref<1x128x4xf32, #tpu.memory_space<vmem>>, vector<1x30x4xf32>
    %1 = vector.shape_cast %0 : vector<1x30x4xf32> to vector<30x4xf32>
    %c0_2 = arith.constant 0 : index
    %c0_3 = arith.constant 0 : index
    %2 = vector.load %arg11[%c0_2, %c0_3] : memref<60x20xf32, #tpu.memory_space<vmem>>, vector<30x4xf32>
    tpu.vector_store %arg11[%c0_2, %c0_3], %1 {strides = array<i32>} : memref<60x20xf32, #tpu.memory_space<vmem>>, vector<30x4xf32>,
    %c0_4 = arith.constant 0 : index
    %c1 = arith.constant 1 : index
    %c0_5 = arith.constant 0 : index
    %3 = tpu.strided_load %arg1[%c0_4, %c1, %c0_5] {strides = array<i32: 1, 2, 1>} : memref<1x128x4xf32, #tpu.memory_space<vmem>>, vector<1x30x4xf32>
    %4 = vector.shape_cast %3 : vector<1x30x4xf32> to vector<30x4xf32>
    %c0_6 = arith.constant 0 : index
    %c4 = arith.constant 4 : index
    %5 = vector.load %arg11[%c0_6, %c4] : memref<60x20xf32, #tpu.memory_space<vmem>>, vector<30x4xf32>
    tpu.vector_store %arg11[%c0_6, %c4], %4 {strides = array<i32>} : memref<60x20xf32, #tpu.memory_space<vmem>>, vector<30x4xf32>,
    %c0_7 = arith.constant 0 : index
    %c2 = arith.constant 2 : index
    %c0_8 = arith.constant 0 : index
    %6 = tpu.strided_load %arg1[%c0_7, %c2, %c0_8] {strides = array<i32: 1, 2, 1>} : memref<1x128x4xf32, #tpu.memory_space<vmem>>, vector<1x30x4xf32>
    %7 = vector.shape_cast %6 : vector<1x30x4xf32> to vector<30x4xf32>
    %c0_9 = arith.constant 0 : index
    %c8 = arith.constant 8 : index
    %8 = vector.load %arg11[%c0_9, %c8] : memref<60x20xf32, #tpu.memory_space<vmem>>, vector<30x4xf32>
    tpu.vector_store %arg11[%c0_9, %c8], %7 {strides = array<i32>} : memref<60x20xf32, #tpu.memory_space<vmem>>, vector<30x4xf32>,
    %c0_10 = arith.constant 0 : index
    %c3 = arith.constant 3 : index
    %c0_11 = arith.constant 0 : index
    %9 = tpu.strided_load %arg1[%c0_10, %c3, %c0_11] {strides = array<i32: 1, 2, 1>} : memref<1x128x4xf32, #tpu.memory_space<vmem>>, vector<1x30x4xf32>
    %10 = vector.shape_cast %9 : vector<1x30x4xf32> to vector<30x4xf32>
    %c0_12 = arith.constant 0 : index
    %c12 = arith.constant 12 : index
    %11 = vector.load %arg11[%c0_12, %c12] : memref<60x20xf32, #tpu.memory_space<vmem>>, vector<30x4xf32>
    tpu.vector_store %arg11[%c0_12, %c12], %10 {strides = array<i32>} : memref<60x20xf32, #tpu.memory_space<vmem>>, vector<30x4xf32>,
    %c0_13 = arith.constant 0 : index
    %c4_14 = arith.constant 4 : index
    %c0_15 = arith.constant 0 : index
    %12 = tpu.strided_load %arg1[%c0_13, %c4_14, %c0_15] {strides = array<i32: 1, 2, 1>} : memref<1x128x4xf32, #tpu.memory_space<vmem>>, vector<1x30x4xf32>
    %13 = vector.shape_cast %12 : vector<1x30x4xf32> to vector<30x4xf32>
    %c0_16 = arith.constant 0 : index
    %c16 = arith.constant 16 : index
    %14 = vector.load %arg11[%c0_16, %c16] : memref<60x20xf32, #tpu.memory_space<vmem>>, vector<30x4xf32>
    tpu.vector_store %arg11[%c0_16, %c16], %13 {strides = array<i32>} : memref<60x20xf32, #tpu.memory_space<vmem>>, vector<30x4xf32>,
    %c0_17 = arith.constant 0 : index
    %c64 = arith.constant 64 : index
    %c0_18 = arith.constant 0 : index
    %15 = tpu.strided_load %arg1[%c0_17, %c64, %c0_18] {strides = array<i32: 1, 2, 1>} : memref<1x128x4xf32, #tpu.memory_space<vmem>>, vector<1x30x4xf32>
    %16 = vector.shape_cast %15 : vector<1x30x4xf32> to vector<30x4xf32>
    %c30 = arith.constant 30 : index
    %c0_19 = arith.constant 0 : index
    %17 = vector.load %arg11[%c30, %c0_19] : memref<60x20xf32, #tpu.memory_space<vmem>>, vector<30x4xf32>
    tpu.vector_store %arg11[%c30, %c0_19], %16 {strides = array<i32>} : memref<60x20xf32, #tpu.memory_space<vmem>>, vector<30x4xf32>,
    %c0_20 = arith.constant 0 : index
    %c65 = arith.constant 65 : index
    %c0_21 = arith.constant 0 : index
    %18 = tpu.strided_load %arg1[%c0_20, %c65, %c0_21] {strides = array<i32: 1, 2, 1>} : memref<1x128x4xf32, #tpu.memory_space<vmem>>, vector<1x30x4xf32>
    %19 = vector.shape_cast %18 : vector<1x30x4xf32> to vector<30x4xf32>
    %c30_22 = arith.constant 30 : index
    %c4_23 = arith.constant 4 : index
    %20 = vector.load %arg11[%c30_22, %c4_23] : memref<60x20xf32, #tpu.memory_space<vmem>>, vector<30x4xf32>
    tpu.vector_store %arg11[%c30_22, %c4_23], %19 {strides = array<i32>} : memref<60x20xf32, #tpu.memory_space<vmem>>, vector<30x4xf32>,
    %c0_24 = arith.constant 0 : index
    %c66 = arith.constant 66 : index
    %c0_25 = arith.constant 0 : index
    %21 = tpu.strided_load %arg1[%c0_24, %c66, %c0_25] {strides = array<i32: 1, 2, 1>} : memref<1x128x4xf32, #tpu.memory_space<vmem>>, vector<1x30x4xf32>
    %22 = vector.shape_cast %21 : vector<1x30x4xf32> to vector<30x4xf32>
    %c30_26 = arith.constant 30 : index
    %c8_27 = arith.constant 8 : index
    %23 = vector.load %arg11[%c30_26, %c8_27] : memref<60x20xf32, #tpu.memory_space<vmem>>, vector<30x4xf32>
    tpu.vector_store %arg11[%c30_26, %c8_27], %22 {strides = array<i32>} : memref<60x20xf32, #tpu.memory_space<vmem>>, vector<30x4xf32>,
    %c0_28 = arith.constant 0 : index
    %c67 = arith.constant 67 : index
    %c0_29 = arith.constant 0 : index
    %24 = tpu.strided_load %arg1[%c0_28, %c67, %c0_29] {strides = array<i32: 1, 2, 1>} : memref<1x128x4xf32, #tpu.memory_space<vmem>>, vector<1x30x4xf32>
    %25 = vector.shape_cast %24 : vector<1x30x4xf32> to vector<30x4xf32>
    %c30_30 = arith.constant 30 : index
    %c12_31 = arith.constant 12 : index
    %26 = vector.load %arg11[%c30_30, %c12_31] : memref<60x20xf32, #tpu.memory_space<vmem>>, vector<30x4xf32>
    tpu.vector_store %arg11[%c30_30, %c12_31], %25 {strides = array<i32>} : memref<60x20xf32, #tpu.memory_space<vmem>>, vector<30x4xf32>,
    %c0_32 = arith.constant 0 : index
    %c68 = arith.constant 68 : index
    %c0_33 = arith.constant 0 : index
    %27 = tpu.strided_load %arg1[%c0_32, %c68, %c0_33] {strides = array<i32: 1, 2, 1>} : memref<1x128x4xf32, #tpu.memory_space<vmem>>, vector<1x30x4xf32>
    %28 = vector.shape_cast %27 : vector<1x30x4xf32> to vector<30x4xf32>
    %c30_34 = arith.constant 30 : index
    %c16_35 = arith.constant 16 : index
    %29 = vector.load %arg11[%c30_34, %c16_35] : memref<60x20xf32, #tpu.memory_space<vmem>>, vector<30x4xf32>
    tpu.vector_store %arg11[%c30_34, %c16_35], %28 {strides = array<i32>} : memref<60x20xf32, #tpu.memory_space<vmem>>, vector<30x4xf32>,
    %c0_36 = arith.constant 0 : index
    %c0_37 = arith.constant 0 : index
    %30 = vector.load %arg11[%c0_36, %c0_37] : memref<60x20xf32, #tpu.memory_space<vmem>>, vector<60x20xf32>
    %c0_38 = arith.constant 0 : index
    %c0_39 = arith.constant 0 : index
    %31 = vector.load %arg2[%c0_38, %c0_39] : memref<20x32xf32, #tpu.memory_space<vmem>>, vector<20x32xf32>
    %cst = arith.constant dense<0.000000e+00> : vector<60x32xf32>
    %32 = tpu.matmul %30, %31, %cst {dimension_numbers = #tpu.dot_dimension_numbers<[1], [0], [0], [1], [0, 0, 1, 1], [], []>} : vector<60x20xf32>, vector<20x32xf32>, vector<60x32xf32> -> vector<60x32xf32>
    %c0_40 = arith.constant 0 : index
    %c0_41 = arith.constant 0 : index
    %33 = vector.load %arg3[%c0_40, %c0_41] : memref<1x32xf32, #tpu.memory_space<vmem>>, vector<1x32xf32>
    %34 = vector.broadcast %33 : vector<1x32xf32> to vector<60x32xf32>
    %35 = arith.addf %32, %34 : vector<60x32xf32>
    %cst_42 = arith.constant 0.000000e+00 : f32
    %36 = vector.broadcast %cst_42 : f32 to vector<60x32xf32>
    %37 = arith.maximumf %35, %36 : vector<60x32xf32>
    %c0_43 = arith.constant 0 : index
    %c0_44 = arith.constant 0 : index
    %38 = vector.load %arg12[%c0_43, %c0_44] : memref<60x32xf32, #tpu.memory_space<vmem>>, vector<60x32xf32>
    tpu.vector_store %arg12[%c0_43, %c0_44], %37 {strides = array<i32>} : memref<60x32xf32, #tpu.memory_space<vmem>>, vector<60x32xf32>,
    %c0_45 = arith.constant 0 : index
    %c0_46 = arith.constant 0 : index
    %39 = vector.load %arg12[%c0_45, %c0_46] : memref<60x32xf32, #tpu.memory_space<vmem>>, vector<28x32xf32>
    %c0_47 = arith.constant 0 : index
    %c0_48 = arith.constant 0 : index
    %40 = vector.load %arg13[%c0_47, %c0_48] : memref<56x96xf32, #tpu.memory_space<vmem>>, vector<28x32xf32>
    tpu.vector_store %arg13[%c0_47, %c0_48], %39 {strides = array<i32>} : memref<56x96xf32, #tpu.memory_space<vmem>>, vector<28x32xf32>,
    %c1_49 = arith.constant 1 : index
    %c0_50 = arith.constant 0 : index
    %41 = vector.load %arg12[%c1_49, %c0_50] : memref<60x32xf32, #tpu.memory_space<vmem>>, vector<28x32xf32>
    %c0_51 = arith.constant 0 : index
    %c32 = arith.constant 32 : index
    %42 = vector.load %arg13[%c0_51, %c32] : memref<56x96xf32, #tpu.memory_space<vmem>>, vector<28x32xf32>
    tpu.vector_store %arg13[%c0_51, %c32], %41 {strides = array<i32>} : memref<56x96xf32, #tpu.memory_space<vmem>>, vector<28x32xf32>,
    %c2_52 = arith.constant 2 : index
    %c0_53 = arith.constant 0 : index
    %43 = vector.load %arg12[%c2_52, %c0_53] : memref<60x32xf32, #tpu.memory_space<vmem>>, vector<28x32xf32>
    %c0_54 = arith.constant 0 : index
    %c64_55 = arith.constant 64 : index
    %44 = vector.load %arg13[%c0_54, %c64_55] : memref<56x96xf32, #tpu.memory_space<vmem>>, vector<28x32xf32>
    tpu.vector_store %arg13[%c0_54, %c64_55], %43 {strides = array<i32>} : memref<56x96xf32, #tpu.memory_space<vmem>>, vector<28x32xf32>,
    %c30_56 = arith.constant 30 : index
    %c0_57 = arith.constant 0 : index
    %45 = vector.load %arg12[%c30_56, %c0_57] : memref<60x32xf32, #tpu.memory_space<vmem>>, vector<28x32xf32>
    %c28 = arith.constant 28 : index
    %c0_58 = arith.constant 0 : index
    %46 = vector.load %arg13[%c28, %c0_58] : memref<56x96xf32, #tpu.memory_space<vmem>>, vector<28x32xf32>
    tpu.vector_store %arg13[%c28, %c0_58], %45 {strides = array<i32>} : memref<56x96xf32, #tpu.memory_space<vmem>>, vector<28x32xf32>,
    %c31 = arith.constant 31 : index
    %c0_59 = arith.constant 0 : index
    %47 = vector.load %arg12[%c31, %c0_59] : memref<60x32xf32, #tpu.memory_space<vmem>>, vector<28x32xf32>
    %c28_60 = arith.constant 28 : index
    %c32_61 = arith.constant 32 : index
    %48 = vector.load %arg13[%c28_60, %c32_61] : memref<56x96xf32, #tpu.memory_space<vmem>>, vector<28x32xf32>
    tpu.vector_store %arg13[%c28_60, %c32_61], %47 {strides = array<i32>} : memref<56x96xf32, #tpu.memory_space<vmem>>, vector<28x32xf32>,
    %c32_62 = arith.constant 32 : index
    %c0_63 = arith.constant 0 : index
    %49 = vector.load %arg12[%c32_62, %c0_63] : memref<60x32xf32, #tpu.memory_space<vmem>>, vector<28x32xf32>
    %c28_64 = arith.constant 28 : index
    %c64_65 = arith.constant 64 : index
    %50 = vector.load %arg13[%c28_64, %c64_65] : memref<56x96xf32, #tpu.memory_space<vmem>>, vector<28x32xf32>
    tpu.vector_store %arg13[%c28_64, %c64_65], %49 {strides = array<i32>} : memref<56x96xf32, #tpu.memory_space<vmem>>, vector<28x32xf32>,
    %c0_66 = arith.constant 0 : index
    %c0_67 = arith.constant 0 : index
    %51 = vector.load %arg13[%c0_66, %c0_67] : memref<56x96xf32, #tpu.memory_space<vmem>>, vector<56x96xf32>
    %c0_68 = arith.constant 0 : index
    %c0_69 = arith.constant 0 : index
    %52 = vector.load %arg4[%c0_68, %c0_69] : memref<96x32xf32, #tpu.memory_space<vmem>>, vector<96x32xf32>
    %cst_70 = arith.constant dense<0.000000e+00> : vector<56x32xf32>
    %53 = tpu.matmul %51, %52, %cst_70 {dimension_numbers = #tpu.dot_dimension_numbers<[1], [0], [0], [1], [0, 0, 1, 1], [], []>} : vector<56x96xf32>, vector<96x32xf32>, vector<56x32xf32> -> vector<56x32xf32>
    %c0_71 = arith.constant 0 : index
    %c0_72 = arith.constant 0 : index
    %54 = vector.load %arg5[%c0_71, %c0_72] : memref<1x32xf32, #tpu.memory_space<vmem>>, vector<1x32xf32>
    %55 = vector.broadcast %54 : vector<1x32xf32> to vector<56x32xf32>
    %56 = arith.addf %53, %55 : vector<56x32xf32>
    %cst_73 = arith.constant 0.000000e+00 : f32
    %57 = vector.broadcast %cst_73 : f32 to vector<56x32xf32>
    %58 = arith.maximumf %56, %57 : vector<56x32xf32>
    %c0_74 = arith.constant 0 : index
    %c0_75 = arith.constant 0 : index
    %59 = vector.load %arg14[%c0_74, %c0_75] : memref<56x32xf32, #tpu.memory_space<vmem>>, vector<56x32xf32>
    tpu.vector_store %arg14[%c0_74, %c0_75], %58 {strides = array<i32>} : memref<56x32xf32, #tpu.memory_space<vmem>>, vector<56x32xf32>,
    %c0_76 = arith.constant 0 : index
    %c0_77 = arith.constant 0 : index
    %60 = tpu.strided_load %arg14[%c0_76, %c0_77] {strides = array<i32: 2, 1>} : memref<56x32xf32, #tpu.memory_space<vmem>>, vector<13x32xf32>
    %c0_78 = arith.constant 0 : index
    %c0_79 = arith.constant 0 : index
    %61 = vector.load %arg15[%c0_78, %c0_79] : memref<26x96xf32, #tpu.memory_space<vmem>>, vector<13x32xf32>
    tpu.vector_store %arg15[%c0_78, %c0_79], %60 {strides = array<i32>} : memref<26x96xf32, #tpu.memory_space<vmem>>, vector<13x32xf32>,
    %c1_80 = arith.constant 1 : index
    %c0_81 = arith.constant 0 : index
    %62 = tpu.strided_load %arg14[%c1_80, %c0_81] {strides = array<i32: 2, 1>} : memref<56x32xf32, #tpu.memory_space<vmem>>, vector<13x32xf32>
    %c0_82 = arith.constant 0 : index
    %c32_83 = arith.constant 32 : index
    %63 = vector.load %arg15[%c0_82, %c32_83] : memref<26x96xf32, #tpu.memory_space<vmem>>, vector<13x32xf32>
    tpu.vector_store %arg15[%c0_82, %c32_83], %62 {strides = array<i32>} : memref<26x96xf32, #tpu.memory_space<vmem>>, vector<13x32xf32>,
    %c2_84 = arith.constant 2 : index
    %c0_85 = arith.constant 0 : index
    %64 = tpu.strided_load %arg14[%c2_84, %c0_85] {strides = array<i32: 2, 1>} : memref<56x32xf32, #tpu.memory_space<vmem>>, vector<13x32xf32>
    %c0_86 = arith.constant 0 : index
    %c64_87 = arith.constant 64 : index
    %65 = vector.load %arg15[%c0_86, %c64_87] : memref<26x96xf32, #tpu.memory_space<vmem>>, vector<13x32xf32>
    tpu.vector_store %arg15[%c0_86, %c64_87], %64 {strides = array<i32>} : memref<26x96xf32, #tpu.memory_space<vmem>>, vector<13x32xf32>,
    %c28_88 = arith.constant 28 : index
    %c0_89 = arith.constant 0 : index
    %66 = tpu.strided_load %arg14[%c28_88, %c0_89] {strides = array<i32: 2, 1>} : memref<56x32xf32, #tpu.memory_space<vmem>>, vector<13x32xf32>
    %c13 = arith.constant 13 : index
    %c0_90 = arith.constant 0 : index
    %67 = vector.load %arg15[%c13, %c0_90] : memref<26x96xf32, #tpu.memory_space<vmem>>, vector<13x32xf32>
    tpu.vector_store %arg15[%c13, %c0_90], %66 {strides = array<i32>} : memref<26x96xf32, #tpu.memory_space<vmem>>, vector<13x32xf32>,
    %c29 = arith.constant 29 : index
    %c0_91 = arith.constant 0 : index
    %68 = tpu.strided_load %arg14[%c29, %c0_91] {strides = array<i32: 2, 1>} : memref<56x32xf32, #tpu.memory_space<vmem>>, vector<13x32xf32>
    %c13_92 = arith.constant 13 : index
    %c32_93 = arith.constant 32 : index
    %69 = vector.load %arg15[%c13_92, %c32_93] : memref<26x96xf32, #tpu.memory_space<vmem>>, vector<13x32xf32>
    tpu.vector_store %arg15[%c13_92, %c32_93], %68 {strides = array<i32>} : memref<26x96xf32, #tpu.memory_space<vmem>>, vector<13x32xf32>,
    %c30_94 = arith.constant 30 : index
    %c0_95 = arith.constant 0 : index
    %70 = tpu.strided_load %arg14[%c30_94, %c0_95] {strides = array<i32: 2, 1>} : memref<56x32xf32, #tpu.memory_space<vmem>>, vector<13x32xf32>
    %c13_96 = arith.constant 13 : index
    %c64_97 = arith.constant 64 : index
    %71 = vector.load %arg15[%c13_96, %c64_97] : memref<26x96xf32, #tpu.memory_space<vmem>>, vector<13x32xf32>
    tpu.vector_store %arg15[%c13_96, %c64_97], %70 {strides = array<i32>} : memref<26x96xf32, #tpu.memory_space<vmem>>, vector<13x32xf32>,
    %c0_98 = arith.constant 0 : index
    %c0_99 = arith.constant 0 : index
    %72 = vector.load %arg15[%c0_98, %c0_99] : memref<26x96xf32, #tpu.memory_space<vmem>>, vector<26x96xf32>
    %c0_100 = arith.constant 0 : index
    %c0_101 = arith.constant 0 : index
    %73 = vector.load %arg6[%c0_100, %c0_101] : memref<96x64xf32, #tpu.memory_space<vmem>>, vector<96x64xf32>
    %cst_102 = arith.constant dense<0.000000e+00> : vector<26x64xf32>
    %74 = tpu.matmul %72, %73, %cst_102 {dimension_numbers = #tpu.dot_dimension_numbers<[1], [0], [0], [1], [0, 0, 1, 1], [], []>} : vector<26x96xf32>, vector<96x64xf32>, vector<26x64xf32> -> vector<26x64xf32>
    %c0_103 = arith.constant 0 : index
    %c0_104 = arith.constant 0 : index
    %75 = vector.load %arg7[%c0_103, %c0_104] : memref<1x64xf32, #tpu.memory_space<vmem>>, vector<1x64xf32>
    %76 = vector.broadcast %75 : vector<1x64xf32> to vector<26x64xf32>
    %77 = arith.addf %74, %76 : vector<26x64xf32>
    %cst_105 = arith.constant 0.000000e+00 : f32
    %78 = vector.broadcast %cst_105 : f32 to vector<26x64xf32>
    %79 = arith.maximumf %77, %78 : vector<26x64xf32>
    %c0_106 = arith.constant 0 : index
    %c0_107 = arith.constant 0 : index
    %80 = vector.load %arg16[%c0_106, %c0_107] : memref<26x64xf32, #tpu.memory_space<vmem>>, vector<26x64xf32>
    tpu.vector_store %arg16[%c0_106, %c0_107], %79 {strides = array<i32>} : memref<26x64xf32, #tpu.memory_space<vmem>>, vector<26x64xf32>,
    %c0_108 = arith.constant 0 : index
    %c0_109 = arith.constant 0 : index
    %81 = tpu.strided_load %arg16[%c0_108, %c0_109] {strides = array<i32: 2, 1>} : memref<26x64xf32, #tpu.memory_space<vmem>>, vector<6x64xf32>
    %c0_110 = arith.constant 0 : index
    %c0_111 = arith.constant 0 : index
    %82 = vector.load %arg17[%c0_110, %c0_111] : memref<12x192xf32, #tpu.memory_space<vmem>>, vector<6x64xf32>
    tpu.vector_store %arg17[%c0_110, %c0_111], %81 {strides = array<i32>} : memref<12x192xf32, #tpu.memory_space<vmem>>, vector<6x64xf32>,
    %c1_112 = arith.constant 1 : index
    %c0_113 = arith.constant 0 : index
    %83 = tpu.strided_load %arg16[%c1_112, %c0_113] {strides = array<i32: 2, 1>} : memref<26x64xf32, #tpu.memory_space<vmem>>, vector<6x64xf32>
    %c0_114 = arith.constant 0 : index
    %c64_115 = arith.constant 64 : index
    %84 = vector.load %arg17[%c0_114, %c64_115] : memref<12x192xf32, #tpu.memory_space<vmem>>, vector<6x64xf32>
    tpu.vector_store %arg17[%c0_114, %c64_115], %83 {strides = array<i32>} : memref<12x192xf32, #tpu.memory_space<vmem>>, vector<6x64xf32>,
    %c2_116 = arith.constant 2 : index
    %c0_117 = arith.constant 0 : index
    %85 = tpu.strided_load %arg16[%c2_116, %c0_117] {strides = array<i32: 2, 1>} : memref<26x64xf32, #tpu.memory_space<vmem>>, vector<6x64xf32>
    %c0_118 = arith.constant 0 : index
    %c128 = arith.constant 128 : index
    %86 = vector.load %arg17[%c0_118, %c128] : memref<12x192xf32, #tpu.memory_space<vmem>>, vector<6x64xf32>
    tpu.vector_store %arg17[%c0_118, %c128], %85 {strides = array<i32>} : memref<12x192xf32, #tpu.memory_space<vmem>>, vector<6x64xf32>,
    %c13_119 = arith.constant 13 : index
    %c0_120 = arith.constant 0 : index
    %87 = tpu.strided_load %arg16[%c13_119, %c0_120] {strides = array<i32: 2, 1>} : memref<26x64xf32, #tpu.memory_space<vmem>>, vector<6x64xf32>
    %c6 = arith.constant 6 : index
    %c0_121 = arith.constant 0 : index
    %88 = vector.load %arg17[%c6, %c0_121] : memref<12x192xf32, #tpu.memory_space<vmem>>, vector<6x64xf32>
    tpu.vector_store %arg17[%c6, %c0_121], %87 {strides = array<i32>} : memref<12x192xf32, #tpu.memory_space<vmem>>, vector<6x64xf32>,
    %c14 = arith.constant 14 : index
    %c0_122 = arith.constant 0 : index
    %89 = tpu.strided_load %arg16[%c14, %c0_122] {strides = array<i32: 2, 1>} : memref<26x64xf32, #tpu.memory_space<vmem>>, vector<6x64xf32>
    %c6_123 = arith.constant 6 : index
    %c64_124 = arith.constant 64 : index
    %90 = vector.load %arg17[%c6_123, %c64_124] : memref<12x192xf32, #tpu.memory_space<vmem>>, vector<6x64xf32>
    tpu.vector_store %arg17[%c6_123, %c64_124], %89 {strides = array<i32>} : memref<12x192xf32, #tpu.memory_space<vmem>>, vector<6x64xf32>,
    %c15 = arith.constant 15 : index
    %c0_125 = arith.constant 0 : index
    %91 = tpu.strided_load %arg16[%c15, %c0_125] {strides = array<i32: 2, 1>} : memref<26x64xf32, #tpu.memory_space<vmem>>, vector<6x64xf32>
    %c6_126 = arith.constant 6 : index
    %c128_127 = arith.constant 128 : index
    %92 = vector.load %arg17[%c6_126, %c128_127] : memref<12x192xf32, #tpu.memory_space<vmem>>, vector<6x64xf32>
    tpu.vector_store %arg17[%c6_126, %c128_127], %91 {strides = array<i32>} : memref<12x192xf32, #tpu.memory_space<vmem>>, vector<6x64xf32>,
    %c0_128 = arith.constant 0 : index
    %c0_129 = arith.constant 0 : index
    %93 = vector.load %arg17[%c0_128, %c0_129] : memref<12x192xf32, #tpu.memory_space<vmem>>, vector<12x192xf32>
    %c0_130 = arith.constant 0 : index
    %c0_131 = arith.constant 0 : index
    %94 = vector.load %arg8[%c0_130, %c0_131] : memref<192x128xf32, #tpu.memory_space<vmem>>, vector<192x128xf32>
    %cst_132 = arith.constant dense<0.000000e+00> : vector<12x128xf32>
    %95 = tpu.matmul %93, %94, %cst_132 {dimension_numbers = #tpu.dot_dimension_numbers<[1], [0], [0], [1], [0, 0, 1, 1], [], []>} : vector<12x192xf32>, vector<192x128xf32>, vector<12x128xf32> -> vector<12x128xf32>
    %c0_133 = arith.constant 0 : index
    %c0_134 = arith.constant 0 : index
    %96 = vector.load %arg9[%c0_133, %c0_134] : memref<1x128xf32, #tpu.memory_space<vmem>>, vector<1x128xf32>
    %97 = vector.broadcast %96 : vector<1x128xf32> to vector<12x128xf32>
    %98 = arith.addf %95, %97 : vector<12x128xf32>
    %cst_135 = arith.constant 0.000000e+00 : f32
    %99 = vector.broadcast %cst_135 : f32 to vector<12x128xf32>
    %100 = arith.maximumf %98, %99 : vector<12x128xf32>
    %101 = vector.extract_strided_slice %100 {offsets = [0, 0], sizes = [6, 128], strides = [1, 1]} : vector<12x128xf32> to vector<6x128xf32>
    %cst_136 = arith.constant dense<0xFF800000> : vector<128xf32>
    %102 = vector.multi_reduction <maximumf>, %101, %cst_136 [0] : vector<6x128xf32> to vector<128xf32>
    %103 = vector.shape_cast %102 : vector<128xf32> to vector<1x128xf32>
    %c0_137 = arith.constant 0 : index
    %c0_138 = arith.constant 0 : index
    %c0_139 = arith.constant 0 : index
    %104 = vector.load %arg10[%c0_137, %c0_138, %c0_139] : memref<1x2x128xf32, #tpu.memory_space<vmem>>, vector<1x1x128xf32>
    %105 = vector.shape_cast %104 : vector<1x1x128xf32> to vector<1x128xf32>
    %106 = vector.shape_cast %103 : vector<1x128xf32> to vector<1x1x128xf32>
    tpu.vector_store %arg10[%c0_137, %c0_138, %c0_139], %106 {strides = array<i32>} : memref<1x2x128xf32, #tpu.memory_space<vmem>>, vector<1x1x128xf32>,
    %107 = vector.extract_strided_slice %100 {offsets = [6, 0], sizes = [6, 128], strides = [1, 1]} : vector<12x128xf32> to vector<6x128xf32>
    %cst_140 = arith.constant dense<0xFF800000> : vector<128xf32>
    %108 = vector.multi_reduction <maximumf>, %107, %cst_140 [0] : vector<6x128xf32> to vector<128xf32>
    %109 = vector.shape_cast %108 : vector<128xf32> to vector<1x128xf32>
    %c0_141 = arith.constant 0 : index
    %c1_142 = arith.constant 1 : index
    %c0_143 = arith.constant 0 : index
    %110 = vector.load %arg10[%c0_141, %c1_142, %c0_143] : memref<1x2x128xf32, #tpu.memory_space<vmem>>, vector<1x1x128xf32>
    %111 = vector.shape_cast %110 : vector<1x1x128xf32> to vector<1x128xf32>
    %112 = vector.shape_cast %109 : vector<1x128xf32> to vector<1x1x128xf32>
    tpu.vector_store %arg10[%c0_141, %c1_142, %c0_143], %112 {strides = array<i32>} : memref<1x2x128xf32, #tpu.memory_space<vmem>>, vector<1x1x128xf32>,
    return
  }
  func.func @transform_0(%arg0: i32) -> (i32, i32, i32) {
    %c0_i32 = arith.constant 0 : i32
    %c0_i32_0 = arith.constant 0 : i32
    %c0_i32_1 = arith.constant 0 : i32
    return %arg0, %c0_i32, %c0_i32_0 : i32, i32, i32
  }
  func.func @transform_1(%arg0: i32) -> (i32, i32) {
    %c0_i32 = arith.constant 0 : i32
    %c0_i32_0 = arith.constant 0 : i32
    %c0_i32_1 = arith.constant 0 : i32
    return %c0_i32, %c0_i32_0 : i32, i32
  }
  func.func @transform_2(%arg0: i32) -> (i32, i32) {
    %c0_i32 = arith.constant 0 : i32
    %c0_i32_0 = arith.constant 0 : i32
    %c0_i32_1 = arith.constant 0 : i32
    return %c0_i32, %c0_i32_0 : i32, i32
  }
  func.func @transform_3(%arg0: i32) -> (i32, i32) {
    %c0_i32 = arith.constant 0 : i32
    %c0_i32_0 = arith.constant 0 : i32
    %c0_i32_1 = arith.constant 0 : i32
    return %c0_i32, %c0_i32_0 : i32, i32
  }
  func.func @transform_4(%arg0: i32) -> (i32, i32) {
    %c0_i32 = arith.constant 0 : i32
    %c0_i32_0 = arith.constant 0 : i32
    %c0_i32_1 = arith.constant 0 : i32
    return %c0_i32, %c0_i32_0 : i32, i32
  }
  func.func @transform_5(%arg0: i32) -> (i32, i32) {
    %c0_i32 = arith.constant 0 : i32
    %c0_i32_0 = arith.constant 0 : i32
    %c0_i32_1 = arith.constant 0 : i32
    return %c0_i32, %c0_i32_0 : i32, i32
  }
  func.func @transform_6(%arg0: i32) -> (i32, i32) {
    %c0_i32 = arith.constant 0 : i32
    %c0_i32_0 = arith.constant 0 : i32
    %c0_i32_1 = arith.constant 0 : i32
    return %c0_i32, %c0_i32_0 : i32, i32
  }
  func.func @transform_7(%arg0: i32) -> (i32, i32) {
    %c0_i32 = arith.constant 0 : i32
    %c0_i32_0 = arith.constant 0 : i32
    %c0_i32_1 = arith.constant 0 : i32
    return %c0_i32, %c0_i32_0 : i32, i32
  }
  func.func @transform_8(%arg0: i32) -> (i32, i32) {
    %c0_i32 = arith.constant 0 : i32
    %c0_i32_0 = arith.constant 0 : i32
    %c0_i32_1 = arith.constant 0 : i32
    return %c0_i32, %c0_i32_0 : i32, i32
  }
  func.func @transform_9(%arg0: i32) -> (i32, i32, i32) {
    %c0_i32 = arith.constant 0 : i32
    %c0_i32_0 = arith.constant 0 : i32
    %c0_i32_1 = arith.constant 0 : i32
    return %arg0, %c0_i32, %c0_i32_0 : i32, i32, i32
  }
}

</mosaic_0001>

<bundles_post_ra>
// kernel: _lambda_.1
= control target key start
LH: loop header
LB: loop body
LE: loop exit
PB: predicated region body
PF: predicated region fallthrough
CT: control target
= control target key end

     0   :  { %14 = vsyncpa [#allocation10], 0  ;;  %s2519_s0 = inlined_call_operand.vmem [shape: f32[2,128,4], index: 0, kind: input, shape index: {}]   ;;  %s2520_s1 = inlined_call_operand.vmem [shape: f32[20,32], index: 1, kind: input, shape index: {}]   ;;  %s2521_s2 = inlined_call_operand.vmem [shape: f32[1,32], index: 2, kind: input, shape index: {}]   ;;  %s2522_s3 = inlined_call_operand.hbm [shape: f32[96,32], index: 3, kind: input, shape index: {}]   ;;  %s2523_s4 = inlined_call_operand.vmem [shape: f32[1,32], index: 4, kind: input, shape index: {}]   ;;  %s2524_s5 = inlined_call_operand.hbm [shape: f32[96,64], index: 5, kind: input, shape index: {}]   ;;  %s2525_s6 = inlined_call_operand.vmem [shape: f32[1,64], index: 6, kind: input, shape index: {}]   ;;  %s2526_s7 = inlined_call_operand.vmem [shape: f32[192,128], index: 7, kind: input, shape index: {}]   ;;  %s2527_s8 = inlined_call_operand.vmem [shape: f32[1,128], index: 8, kind: input, shape index: {}]   ;;  %s2528_s9 = inlined_call_operand.hbm [shape: f32[2,2,128], index: 9, kind: output, shape index: {}]  }
   0x1   :  { %15 = vsyncpa [#allocation13], 0 }
   0x2   :  { %16 = vsyncpa [#allocation11], 0 }
   0x3   :  { %18 = vsyncpa [#allocation11 + $0x1], 0  ;;  %s2015_s30 = smov 0   ;;  %s2017_s10 = smov 0  }
   0x4   :  { %s2019_s11 = smov 0   ;;  %s2021_s12 = smov 0  }
   0x5 LB: > { %s2036_s13 = sadd.s32 4294967295, %s1950_s12   ;;  %s1540_s14 = sadd.s32 4294967294, %s1950_s12   ;;  %s1950_s12 = sphi %s2021_s12, %s2542_s12   ;;  %s1946_s11 = sphi %s2019_s11, %s2541_s11   ;;  %s1942_s10 = sphi %s2017_s10, %s2540_s10   ;;  %s1938_s30 = sphi %s2015_s30, %s2539_s30  }
   0x6   : > { %s2040_s15 = sadd.s32 1, %s1950_s12   ;;  %s225_s16 = sadd.s32 1, %s1946_s11 }
   0x7   : > { %s222_s17 = ssub.s32 %s1950_s12, %s2040_s15  ;;  %p235_p0 = scmp.ne.s32.totalorder %s1946_s11, %s1942_s10 }
   0x8   : > { %p223_p1 = scmp.eq.s32.totalorder %s222_s17, 0  ;;  %p236_p2 = scmp.eq.s32.totalorder %s2036_s13, 1 }
   0x9   : > { %p241_p3 = scmp.ne.s32.totalorder %s1942_s10, %s1938_s30  ;;  %p242_p4 = scmp.eq.s32.totalorder %s1540_s14, 1 }
   0xa   : > { %s2051_s18 = scalar_select %p223_p1, %s1946_s11, %s225_s16  }
   0xb   : > { %p2053_p5 = por %p236_p2, %p235_p0  ;;  %p2057_p6 = por %p242_p4, %p241_p3 }
   0xc   : > { %p1541_p7 = scmp.ge.s32.totalorder %s1950_s12, 1  ;;  %p249_p8 = scmp.lt.s32.totalorder %s1950_s12, 3 }
   0xd   : > { %s2531_s20 = scalar_select %p2057_p6, 1, 0 }
   0xe   : > { %p2529_p9 = scmp.eq.s32.totalorder %s2036_s13, 0  ;;  %p2064_p10 = pnand %p1541_p7, %p249_p8 }
   0xf   : > { %s1952_s22 = smov [#allocation9]   ;;  %s1953_s25 = smov [#allocation12]  }
  0x10   : > { %s267_s23 = sshll.u32 %s1952_s22, 4  ;;  %p1770_p11 = pneg %p2064_p10  ;;  %s268_s23 = int_to_ptr.vmem [resolvable:$true] %s267_s23 }
  0x11   : > { %s283_s26 = sshll.u32 %s1953_s25, 4  ;;  %s1841_s27 = scalar_lea.vmem %s268_s23, 1536  ;;  %s284_s26 = int_to_ptr.vmem [resolvable:$true] %s283_s26 }
  0x12   : > { %p2072_p12 = pnand %p2529_p9, %p1770_p11  ;;  %p1842_p0 = scmp.ne.s32.totalorder %s268_s23, %s1841_s27 }
  0x13   : > { %p1849_p3 = scmp.lt.s32.totalorder %s268_s23, %s268_s23  ;;  %p1850_p4 = scmp.lt.s32.totalorder %s1841_s27, %s1841_s27 }
  0x14   : > { %p1832_p13 = pneg %p2072_p12 }
  0x15   : > { %p1851_p7 = por %p1850_p4, %p1849_p3 }
  0x16   : > { %p1844_p1 = pnand %p1842_p0, %p1832_p13 }
  0x18   : > { %p1845_p2 = pneg %p1844_p1 }
  0x1a   : > { %p1852_p8 = pnand %p1851_p7, %p1845_p2 }
  0x1c   : > { %1855 = shalt.err (!%p1852_p8)
}
  0x1d   : > { %s1954_s28 = smov 128   ;;  %s1955_s29 = smov 8  }
  0x1e   : > { %1773 = dma.hbm_to_vmem [thread:$0]  (!%p2072_p12), %s2522_s3, 1536, %s268_s23, [#allocation10], %s1954_s28, %s1954_s28, %s1955_s29  }
  0x1f   : > { %s1867_s17 = scalar_lea.vmem %s284_s26, 1536  ;;  %p1875_p9 = scmp.lt.s32.totalorder %s284_s26, %s284_s26 }
  0x20   : > { %p1868_p11 = scmp.ne.s32.totalorder %s284_s26, %s1867_s17  ;;  %p1876_p6 = scmp.lt.s32.totalorder %s1867_s17, %s1867_s17 }
  0x22   : > { %p1870_p0 = pnand %p1868_p11, %p1832_p13  ;;  %p1877_p3 = por %p1876_p6, %p1875_p9 }
  0x24   : > { %p1871_p1 = pneg %p1870_p0 }
  0x26   : > { %p1878_p2 = pnand %p1877_p3, %p1871_p1 }
  0x28   : > { %1881 = shalt.err (!%p1878_p2)
}
  0x29   : > { %1776 = dma.hbm_to_vmem [thread:$0]  (!%p2072_p12), %s2524_s5, 1536, %s284_s26, [#allocation13], %s1954_s28, %s1954_s28, %s1955_s29  }
  0x2a   : > { %316 = sbr.rel (%p2064_p10) target bundleno = 1474 (0x5c2), region = 56  ;;  %p2534_p4 = scmp.eq.s32.totalorder (!%p2064_p10), %s2036_s13, 0 }
  0x2f   : > { %1925 = dma.done.wait (%p2534_p4), [#allocation10], 1536   ;;  %p2535_p13 = pmov %p2534_p4 }
  0x30   : > { %p2536_p7 = pmov %p2534_p4 }
  0x31   : > { %1927 = vsyncadd (%p2535_p13), [#allocation10], 4294965760 }
  0x32   : > { %1929 = dma.done.wait (%p2536_p7), [#allocation13], 1536   ;;  %p2537_p6 = pmov %p2534_p4 }
  0x33   : > { %p356_p9 = scmp.lt.s32.totalorder %s2036_s13, 1  ;;  %s1956_s28 = smov 8   ;;  %vm368_vm0 = vcmask 31744   ;;  %vm372_vm1 = vcmask 29696   ;;  %vm661_vm2 = vcmask 1043456   ;;  %v627_v16 = vld [vmem:[%s2520_s1 + $0x8] sm:$0xff] }
  0x34   : > { %1931 = vsyncadd (%p2537_p6), [#allocation13], 4294965760  ;;  %s1957_s29 = smov 4   ;;  %s1958_s14 = smov 12   ;;  %v628_v14 = vld [vmem:[%s2520_s1 + $0x10] sm:$0xf] }
  0x35   : > { %s357_s23 = scalar_select %p356_p9, %s2036_s13, 1  ;;  %1667 = vmatprep.subr.msk.mxu1 %vm661_vm2, %v628_v14  ;;  %v626_v19 = vld [vmem:[%s2520_s1] sm:$0xff]  ;;  %vm398_vm3 = vcmask 64544   ;;  %vm428_vm4 = vcmask 97344   ;;  %vm458_vm5 = vcmask 130144   ;;  %vm488_vm6 = vcmask 162944  }
  0x36   : > { %s1959_s16 = smov 16   ;;  %1668 = vmatpush3.msk.msra.mxu1 %vm661_vm2, %v628_v14  ;;  %vm402_vm7 = vcmask 62496   ;;  %vm636_vm8 = vcmask 162816   ;;  %vm432_vm9 = vcmask 95296   ;;  %vm462_vm10 = vcmask 128096  }
  0x37   : > { %s1620_s24 = sshll.u32 %s357_s23, 7  ;;  %1669 = vmatprep.subr.mxu1 %v627_v16  ;;  %vm492_vm11 = vcmask 160896   ;;  %vm778_vm12 = vcmask 261120   ;;  %vm1961_vm13 = vmmov 0   ;;  %vm786_vm14 = vcmask 257024  }
  0x38   : > { %s2109_s27 = scalar_lea.vmem %s2519_s0, %s1620_s24  ;;  %1670 = vmatpush3.msra.mxu1 %v627_v16  ;;  %vm816_vm15 = vcmask 523520  }
  0x39   : > { %v1558_v0 = vld [vmem:[%s2109_s27 + $0x2] ss:$2 sm:$0xff]  ;;  %v1554_v1 = vld [vmem:[%s2109_s27 + $0x1] ss:$2 sm:$0xff]  ;;  %v1559_v2 = vld [vmem:[%s2109_s27 + $0x12] ss:$2 sm:$0xff]  ;;  %1671 = vmatprep.subr.mxu1 %v626_v19 }
  0x3a   : > { %416 = vrot.lane.b32.xlu1 %v1558_v0, %s1956_s28  ;;  %386 = vrot.lane.b32.xlu0 %v1554_v1, %s1957_s29  ;;  %v1555_v3 = vld [vmem:[%s2109_s27 + $0x11] ss:$2 sm:$0xff]  ;;  %v1556_v6 = vld [vmem:[%s2109_s27 + $0x21] ss:$2 sm:$0xff] }
  0x3b   : > { %v1563_v4 = vld [vmem:[%s2109_s27 + $0x13] ss:$2 sm:$0xff]  ;;  %v1562_v5 = vld [vmem:[%s2109_s27 + $0x3] ss:$2 sm:$0xff]  ;;  %v1566_v7 = vld [vmem:[%s2109_s27 + $0x4] ss:$2 sm:$0xff]  ;;  %1672 = vmatpush3.msra.mxu1 %v626_v19 }
  0x3c   : > { %v1557_v8 = vld [vmem:[%s2109_s27 + $0x31] ss:$2 sm:$0x3f]  ;;  %v1567_v9 = vld [vmem:[%s2109_s27 + $0x14] ss:$2 sm:$0xff]  ;;  %v922_v19 = vld [vmem:[#allocation9 + $0x58] sm:$0xff] }
  0x3d   : > { %v361_v10 = vld [vmem:[%s2109_s27] ss:$2 sm:$0xff]  ;;  %v1551_v11 = vld [vmem:[%s2109_s27 + $0x10] ss:$2 sm:$0xff]  ;;  %v1574_v17 = vld [vmem:[%s2109_s27 + $0x41] ss:$2 sm:$0xff] }
  0x3e   : > { %418 = vrot.lane.b32.xlu1 %v1559_v2, %s1956_s28  ;;  %388 = vrot.lane.b32.xlu0 %v1555_v3, %s1957_s29  ;;  %369 = vst.msk [vmem:[#allocation2] sm:$0xff] %vm368_vm0, %v361_v10  ;;  %370 = vst.msk [vmem:[#allocation2 + $0x8] sm:$0xff] %vm368_vm0, %v1551_v11  ;;  %v1552_v12 = vld [vmem:[%s2109_s27 + $0x20] ss:$2 sm:$0xff]  ;;  %v1564_v20 = vld [vmem:[%s2109_s27 + $0x23] ss:$2 sm:$0xff] }
  0x3f   : > { %v1553_v13 = vld [vmem:[%s2109_s27 + $0x30] ss:$2 sm:$0x3f]  ;;  %371 = vst.msk [vmem:[#allocation2 + $0x10] sm:$0xff] %vm368_vm0, %v1552_v12  ;;  %v1570_v15 = vld [vmem:[%s2109_s27 + $0x40] ss:$2 sm:$0xff] }
  0x40   : > { %373 = vst.msk [vmem:[#allocation2 + $0x18] sm:$0x3f] %vm372_vm1, %v1553_v13  ;;  %v1560_v18 = vld [vmem:[%s2109_s27 + $0x22] ss:$2 sm:$0xff]  ;;  %v1582_v26 = vld [vmem:[%s2109_s27 + $0x43] ss:$2 sm:$0xff] }
  0x41   : > { %502 = vst.msk [vmem:[#allocation2 + $0x1e] sm:$0xff] %vm368_vm0, %v1570_v15  ;;  %v1561_v21 = vld [vmem:[%s2109_s27 + $0x32] ss:$2 sm:$0x3f]  ;;  %v1572_v22 = vld [vmem:[%s2109_s27 + $0x60] ss:$2 sm:$0xff] }
  0x42   : > { %448 = vrot.lane.b32.xlu1 %v1563_v4, %s1958_s14  ;;  %446 = vrot.lane.b32.xlu0 %v1562_v5, %s1958_s14  ;;  %v1565_v23 = vld [vmem:[%s2109_s27 + $0x33] ss:$2 sm:$0x3f]  ;;  %504 = vst.msk [vmem:[#allocation2 + $0x2e] sm:$0xff] %vm368_vm0, %v1572_v22  ;;  %v1578_v24 = vld [vmem:[%s2109_s27 + $0x42] ss:$2 sm:$0xff] }
  0x43   : > { %v1571_v25 = vld [vmem:[%s2109_s27 + $0x50] ss:$2 sm:$0xff]  ;;  %v1576_v30 = vld [vmem:[%s2109_s27 + $0x61] ss:$2 sm:$0xff]  ;;  %v1575_v31 = vld [vmem:[%s2109_s27 + $0x51] ss:$2 sm:$0xff] }
  0x44   : > { %503 = vst.msk [vmem:[#allocation2 + $0x26] sm:$0xff] %vm368_vm0, %v1571_v25  ;;  %v1568_v27 = vld [vmem:[%s2109_s27 + $0x24] ss:$2 sm:$0xff]  ;;  %v1569_v29 = vld [vmem:[%s2109_s27 + $0x34] ss:$2 sm:$0x3f] }
  0x45   : > { %v1586_v28 = vld [vmem:[%s2109_s27 + $0x44] ss:$2 sm:$0xff]  ;;  %v1584_v35 = vld [vmem:[%s2109_s27 + $0x63] ss:$2 sm:$0xff]  ;;  %v1583_v36 = vld [vmem:[%s2109_s27 + $0x53] ss:$2 sm:$0xff] }
  0x46   : > { %390 = vrot.lane.b32.xlu1 %v1556_v6, %s1957_s29  ;;  %476 = vrot.lane.b32.xlu0 %v1566_v7, %s1959_s16  ;;  %v1573_v32 = vld [vmem:[%s2109_s27 + $0x70] ss:$2 sm:$0x3f]  ;;  %v1577_v39 = vld [vmem:[%s2109_s27 + $0x71] ss:$2 sm:$0x3f] }
  0x47   : > { %505 = vst.msk [vmem:[#allocation2 + $0x36] sm:$0x3f] %vm372_vm1, %v1573_v32  ;;  %v1580_v33 = vld [vmem:[%s2109_s27 + $0x62] ss:$2 sm:$0xff]  ;;  %v1579_v34 = vld [vmem:[%s2109_s27 + $0x52] ss:$2 sm:$0xff] }
  0x48   : > { %v1588_v37 = vld [vmem:[%s2109_s27 + $0x64] ss:$2 sm:$0xff]  ;;  %v1587_v38 = vld [vmem:[%s2109_s27 + $0x54] ss:$2 sm:$0xff]  ;;  %vm842_vm0 = vcmask 785920   ;;  %vm930_vm1 = vcmask 785408  }
  0x49   : > { %v1581_v40 = vld [vmem:[%s2109_s27 + $0x72] ss:$2 sm:$0x3f]  ;;  %v1585_v41 = vld [vmem:[%s2109_s27 + $0x73] ss:$2 sm:$0x3f] }
  0x4a   : > { %392 = vrot.lane.b32.xlu1 %v1557_v8, %s1957_s29  ;;  %478 = vrot.lane.b32.xlu0 %v1567_v9, %s1959_s16  ;;  %v1589_v42 = vld [vmem:[%s2109_s27 + $0x74] ss:$2 sm:$0x3f]  ;;  %v917_v25 = vld [vmem:[#allocation9 + $0x30] sm:$0xff]  ;;  %s353_s27 = sand.u32 1, %s1942_s10  }
  0x4b   : > { %v920_v22 = vld [vmem:[#allocation9 + $0x48] sm:$0xff]  ;;  %s1446_s24 = scalar_lea.sflag [#allocation11], %s353_s27 }
  0x4e   : > { %518 = vrot.lane.b32.xlu1 %v1574_v17, %s1957_s29  ;;  %420 = vrot.lane.b32.xlu0 %v1560_v18, %s1956_s28 }
  0x52   : > { %450 = vrot.lane.b32.xlu1 %v1564_v20, %s1958_s14  ;;  %422 = vrot.lane.b32.xlu0 %v1561_v21, %s1956_s28  ;;  %v1960_v20 = vmov 0.0   ;;  %v921_v21 = vld [vmem:[#allocation9 + $0x50] sm:$0xff] }
  0x53   : > { %1685 = vmatprep.subr.mxu0 %v1960_v20  ;;  %1348 = vmatprep.subr.mxu1 %v1960_v20 }
  0x54   : > { %1686 = vmatpush3.msra.mxu0 %v922_v19  ;;  %1709 = vmatprep.mubr.msk.f32.mxu0 %vm1961_vm13, %v1960_v20 }
  0x55   : > { %1687 = vmatprep.subr.mxu0 %v1960_v20 }
  0x56   : > { %452 = vrot.lane.b32.xlu1 %v1565_v23, %s1958_s14  ;;  %546 = vrot.lane.b32.xlu0 %v1578_v24, %s1956_s28  ;;  %v919_v23 = vld [vmem:[#allocation9 + $0x40] sm:$0xff]  ;;  %v918_v24 = vld [vmem:[#allocation9 + $0x38] sm:$0xff] }
  0x57   : > { %1688 = vmatpush3.msra.mxu0 %v921_v21 }
  0x58   : > { %1689 = vmatprep.subr.mxu0 %v1960_v20 }
  0x59   : > { %1690 = vmatpush3.msra.mxu0 %v920_v22 }
  0x5a   : > { %574 = vrot.lane.b32.xlu1 %v1582_v26, %s1958_s14  ;;  %480 = vrot.lane.b32.xlu0 %v1568_v27, %s1959_s16  ;;  %v916_v26 = vld [vmem:[#allocation9 + $0x28] sm:$0xff]  ;;  %v2254_v27 = vld [vmem:[%s2521_s2] ss:$0 sm:$0xff] }
  0x5b   : > { %1691 = vmatprep.subr.mxu0 %v1960_v20 }
  0x5c   : > { %1692 = vmatpush3.msra.mxu0 %v919_v23 }
  0x5d   : > { %1693 = vmatprep.subr.mxu0 %v1960_v20 }
  0x5e   : > { %602 = vrot.lane.b32.xlu1 %v1586_v28, %s1959_s16  ;;  %482 = vrot.lane.b32.xlu0 %v1569_v29, %s1959_s16 }
  0x5f   : > { %1694 = vmatpush3.msra.mxu0 %v918_v24 }
  0x60   : > { %1695 = vmatprep.subr.mxu0 %v1960_v20 }
  0x61   : > { %1696 = vmatpush3.msra.mxu0 %v917_v25 }
  0x62   : > { %522 = vrot.lane.b32.xlu1 %v1576_v30, %s1957_s29  ;;  %520 = vrot.lane.b32.xlu0 %v1575_v31, %s1957_s29  ;;  %v915_v31 = vld [vmem:[#allocation9 + $0x20] sm:$0xff] }
  0x63   : > { %1697 = vmatprep.subr.mxu0 %v1960_v20 }
  0x64   : > { %1698 = vmatpush3.msra.mxu0 %v916_v26 }
  0x65   : > { %1699 = vmatprep.subr.mxu0 %v1960_v20 }
  0x66   : > { %550 = vrot.lane.b32.xlu1 %v1580_v33, %s1956_s28  ;;  %548 = vrot.lane.b32.xlu0 %v1579_v34, %s1956_s28  ;;  %v914_v34 = vld [vmem:[#allocation9 + $0x18] sm:$0xff] }
  0x67   : > { %1700 = vmatpush3.msra.mxu0 %v915_v31 }
  0x68   : > { %1701 = vmatprep.subr.mxu0 %v1960_v20 }
  0x69   : > { %1702 = vmatpush3.msra.mxu0 %v914_v34 }
  0x6a   : > { %578 = vrot.lane.b32.xlu1 %v1584_v35, %s1958_s14  ;;  %576 = vrot.lane.b32.xlu0 %v1583_v36, %s1958_s14  ;;  %v913_v35 = vld [vmem:[#allocation9 + $0x10] sm:$0xff] }
  0x6b   : > { %1703 = vmatprep.subr.mxu0 %v1960_v20 }
  0x6c   : > { %1704 = vmatpush3.msra.mxu0 %v913_v35 }
  0x6d   : > { %1705 = vmatprep.subr.mxu0 %v1960_v20 }
  0x6e   : > { %606 = vrot.lane.b32.xlu1 %v1588_v37, %s1959_s16  ;;  %604 = vrot.lane.b32.xlu0 %v1587_v38, %s1959_s16  ;;  %v912_v37 = vld [vmem:[#allocation9 + $0x8] sm:$0xff]  ;;  %v911_v38 = vld [vmem:[#allocation9] sm:$0xff] }
  0x6f   : > { %1706 = vmatpush3.msra.mxu0 %v912_v37 }
  0x70   : > { %1707 = vmatprep.subr.mxu0 %v1960_v20 }
  0x71   : > { %1708 = vmatpush3.msra.mxu0 %v911_v38 }
  0x72   : > { %524 = vrot.lane.b32.xlu0 %v1577_v39, %s1957_s29  ;;  %552 = vrot.lane.b32.xlu1 %v1581_v40, %s1956_s28  ;;  %s1962_s28 = smov 64   ;;  %s1963_s29 = smov 32  }
  0x76   : > { %580 = vrot.lane.b32.xlu0 %v1585_v41, %s1958_s14  ;;  %608 = vrot.lane.b32.xlu1 %v1589_v42, %s1959_s16  ;;  %s1617_s16 = sshll.u32 %s2036_s13, 5 }
  0x77   : > { %s1457_s23 = scalar_lea.hbm %s2528_s9, %s1617_s16 }
  0xac   : > { %v417_v43 = vpop.permute.xlu1 %416  ;;  %v387_v44 = vpop.permute.xlu0 %386 }
  0xad   : > { %399 = vst.msk [vmem:[#allocation2] sm:$0xff] %vm398_vm3, %v387_v44 }
  0xae   : > { %429 = vst.msk [vmem:[#allocation2] sm:$0xff] %vm428_vm4, %v417_v43 }
  0xb0   : > { %v419_v45 = vpop.permute.xlu1 %418  ;;  %v389_v46 = vpop.permute.xlu0 %388 }
  0xb1   : > { %400 = vst.msk [vmem:[#allocation2 + $0x8] sm:$0xff] %vm398_vm3, %v389_v46 }
  0xb2   : > { %430 = vst.msk [vmem:[#allocation2 + $0x8] sm:$0xff] %vm428_vm4, %v419_v45 }
  0xb4   : > { %v449_v47 = vpop.permute.xlu1 %448  ;;  %v447_v48 = vpop.permute.xlu0 %446 }
  0xb5   : > { %460 = vst.msk [vmem:[#allocation2 + $0x8] sm:$0xff] %vm458_vm5, %v449_v47  ;;  %459 = vst.msk [vmem:[#allocation2] sm:$0xff] %vm458_vm5, %v447_v48 }
  0xb8   : > { %v391_v49 = vpop.permute.xlu1 %390  ;;  %v477_v50 = vpop.permute.xlu0 %476 }
  0xb9   : > { %401 = vst.msk [vmem:[#allocation2 + $0x10] sm:$0xff] %vm398_vm3, %v391_v49 }
  0xba   : > { %489 = vst.msk [vmem:[#allocation2] sm:$0xff] %vm488_vm6, %v477_v50 }
  0xbc   : > { %v393_v51 = vpop.permute.xlu1 %392  ;;  %v479_v52 = vpop.permute.xlu0 %478 }
  0xbd   : > { %403 = vst.msk [vmem:[#allocation2 + $0x18] sm:$0x3f] %vm402_vm7, %v393_v51 }
  0xbe   : > { %490 = vst.msk [vmem:[#allocation2 + $0x8] sm:$0xff] %vm488_vm6, %v479_v52 }
  0xc0   : > { %v519_v53 = vpop.permute.xlu1 %518  ;;  %v421_v54 = vpop.permute.xlu0 %420 }
  0xc1   : > { %v618_v55 = vld [vmem:[#allocation2] sm:$0xff]  ;;  %530 = vst.msk [vmem:[#allocation2 + $0x1e] sm:$0xff] %vm398_vm3, %v519_v53 }
  0xc2   : > { %431 = vst.msk [vmem:[#allocation2 + $0x10] sm:$0xff] %vm428_vm4, %v421_v54  ;;  %1673 = vmatprep.mubr.msk.f32.mxu1 %vm636_vm8, %v618_v55 }
  0xc4   : > { %v451_v56 = vpop.permute.xlu1 %450  ;;  %v423_v57 = vpop.permute.xlu0 %422 }
  0xc5   : > { %v619_v58 = vld [vmem:[#allocation2 + $0x8] sm:$0xff]  ;;  %461 = vst.msk [vmem:[#allocation2 + $0x10] sm:$0xff] %vm458_vm5, %v451_v56 }
  0xc6   : > { %433 = vst.msk [vmem:[#allocation2 + $0x18] sm:$0x3f] %vm432_vm9, %v423_v57  ;;  %1674 = vmatmul.mubr.msk.f32.vlgmr.msra.gmra.mxu1 %vm636_vm8, %v619_v58 }
  0xc8   : > { %v453_v59 = vpop.permute.xlu1 %452  ;;  %v547_v60 = vpop.permute.xlu0 %546 }
  0xc9   : > { %463 = vst.msk [vmem:[#allocation2 + $0x18] sm:$0x3f] %vm462_vm10, %v453_v59 }
  0xca   : > { %558 = vst.msk [vmem:[#allocation2 + $0x1e] sm:$0xff] %vm428_vm4, %v547_v60 }
  0xcc   : > { %v575_v61 = vpop.permute.xlu1 %574  ;;  %v481_v62 = vpop.permute.xlu0 %480 }
  0xcd   : > { %586 = vst.msk [vmem:[#allocation2 + $0x1e] sm:$0xff] %vm458_vm5, %v575_v61 }
  0xce   : > { %491 = vst.msk [vmem:[#allocation2 + $0x10] sm:$0xff] %vm488_vm6, %v481_v62 }
  0xd0   : > { %v603_v63 = vpop.permute.xlu1 %602  ;;  %v483_v0 = vpop.permute.xlu0 %482 }
  0xd1   : > { %614 = vst.msk [vmem:[#allocation2 + $0x1e] sm:$0xff] %vm488_vm6, %v603_v63 }
  0xd2   : > { %493 = vst.msk [vmem:[#allocation2 + $0x18] sm:$0x3f] %vm492_vm11, %v483_v0 }
  0xd4   : > { %v523_v1 = vpop.permute.xlu1 %522  ;;  %v521_v2 = vpop.permute.xlu0 %520 }
  0xd5   : > { %v620_v3 = vld [vmem:[#allocation2 + $0x10] sm:$0xff]  ;;  %532 = vst.msk [vmem:[#allocation2 + $0x2e] sm:$0xff] %vm398_vm3, %v523_v1  ;;  %531 = vst.msk [vmem:[#allocation2 + $0x26] sm:$0xff] %vm398_vm3, %v521_v2  ;;  %vm820_vm3 = vcmask 519424  }
  0xd6   : > { %1676 = vmatprep.mubr.msk.f32.mxu1 %vm636_vm8, %v620_v3 }
  0xd8   : > { %v551_v4 = vpop.permute.xlu1 %550  ;;  %v549_v5 = vpop.permute.xlu0 %548 }
  0xd9   : > { %v621_v6 = vld [vmem:[#allocation2 + $0x18] sm:$0xff]  ;;  %560 = vst.msk [vmem:[#allocation2 + $0x2e] sm:$0xff] %vm428_vm4, %v551_v4  ;;  %559 = vst.msk [vmem:[#allocation2 + $0x26] sm:$0xff] %vm428_vm4, %v549_v5  ;;  %vm846_vm4 = vcmask 781824  }
  0xda   : > { %1677 = vmatmul.mubr.msk.f32.gmra.mxu1 %vm636_vm8, %v621_v6 }
  0xdc   : > { %v579_v7 = vpop.permute.xlu1 %578  ;;  %v577_v8 = vpop.permute.xlu0 %576 }
  0xdd   : > { %588 = vst.msk [vmem:[#allocation2 + $0x2e] sm:$0xff] %vm458_vm5, %v579_v7  ;;  %587 = vst.msk [vmem:[#allocation2 + $0x26] sm:$0xff] %vm458_vm5, %v577_v8  ;;  %vm1070_vm5 = vcmask 258048  }
  0xe0   : > { %v607_v9 = vpop.permute.xlu1 %606  ;;  %v605_v10 = vpop.permute.xlu0 %604 }
  0xe1   : > { %616 = vst.msk [vmem:[#allocation2 + $0x2e] sm:$0xff] %vm488_vm6, %v607_v9  ;;  %615 = vst.msk [vmem:[#allocation2 + $0x26] sm:$0xff] %vm488_vm6, %v605_v10  ;;  %vm1085_vm6 = vcmask 520448  }
  0xe4   : > { %v525_v11 = vpop.permute.xlu0 %524  ;;  %v553_v12 = vpop.permute.xlu1 %552 }
  0xe5   : > { %533 = vst.msk [vmem:[#allocation2 + $0x36] sm:$0x3f] %vm402_vm7, %v525_v11  ;;  %vm1100_vm7 = vcmask 782848  }
  0xe6   : > { %561 = vst.msk [vmem:[#allocation2 + $0x36] sm:$0x3f] %vm432_vm9, %v553_v12  ;;  %vm1264_vm9 = vcmask 517120  }
  0xe8   : > { %v581_v13 = vpop.permute.xlu0 %580  ;;  %v609_v14 = vpop.permute.xlu1 %608  ;;  %v622_v15 = vld [vmem:[#allocation2 + $0x20] sm:$0xff]  ;;  %v623_v16 = vld [vmem:[#allocation2 + $0x28] sm:$0xff] }
  0xe9   : > { %589 = vst.msk [vmem:[#allocation2 + $0x36] sm:$0x3f] %vm462_vm10, %v581_v13  ;;  %1679 = vmatprep.mubr.msk.f32.mxu1 %vm636_vm8, %v622_v15  ;;  %vm1267_vm10 = vcmask 521216  }
  0xea   : > { %617 = vst.msk [vmem:[#allocation2 + $0x36] sm:$0x3f] %vm492_vm11, %v609_v14  ;;  %1680 = vmatmul.mubr.msk.f32.gmra.mxu1 %vm636_vm8, %v623_v16  ;;  %vm1285_vm11 = vcmask 523270  }
  0xf1   : > { %v624_v17 = vld [vmem:[#allocation2 + $0x30] sm:$0xff]  ;;  %v625_v18 = vld [vmem:[#allocation2 + $0x38] sm:$0xf] }
  0xf2   : > { %1682 = vmatprep.mubr.msk.f32.mxu1 %vm636_vm8, %v624_v17 }
  0xf3   : > { %1683 = vmatmul.mubr.msk.f32.gmra.mxu1 %vm636_vm8, %v625_v18  ;;  %vm1260_vm8 = vcmask 523264  }
 0x186   : > { %v1675_v28 = vpop.f32.mrf.mxu1 }
 0x187   : > { %v737_v29 = vadd.f32 %v1675_v28, %v2254_v27 }
 0x188   : > { %v731_v30 = vpop.f32.mrf.mxu1 }
 0x189   : > { %v771_v32 = vmax.f32 %v737_v29, 0.0  ;;  %v732_v33 = vadd.f32 %v2254_v27, %v731_v30 }
 0x18b   : > { %780 = vst.msk [vmem:[#allocation3 + $0x8] sm:$0xff] %vm778_vm12, %v771_v32  ;;  %v770_v36 = vmax.f32 %v732_v33, 0.0 }
 0x18d   : > { %779 = vst.msk [vmem:[#allocation3] sm:$0xff] %vm778_vm12, %v770_v36 }
 0x192   : > { %v789_v39 = vld [vmem:[#allocation3 + $0x8] sm:$0xff] }
 0x193   : > { %793 = vst.msk [vmem:[#allocation4 + $0x8] sm:$0xff] %vm778_vm12, %v789_v39 }
 0x194   : > { %v822_v40 = vld [vmem:[#allocation3 + $0x2] sm:$0xff] }
 0x195   : > { %v796_v41 = vld [vmem:[#allocation3 + $0x1] sm:$0xff]  ;;  %830 = vrot.lane.b32.xlu1 %v822_v40, %s1962_s28 }
 0x196   : > { %v788_v42 = vld [vmem:[#allocation3] sm:$0xff]  ;;  %804 = vrot.lane.b32.xlu0 %v796_v41, %s1963_s29 }
 0x197   : > { %792 = vst.msk [vmem:[#allocation4] sm:$0xff] %vm778_vm12, %v788_v42  ;;  %v2340_v41 = vld [vmem:[%s2523_s4] ss:$0 sm:$0xff] }
 0x19a   : > { %v1678_v43 = vpop.f32.mrf.mxu1 }
 0x19b   : > { %v747_v44 = vadd.f32 %v1678_v43, %v2254_v27 }
 0x19c   : > { %v741_v45 = vpop.f32.mrf.mxu1 }
 0x19d   : > { %v773_v46 = vmax.f32 %v747_v44, 0.0  ;;  %v742_v47 = vadd.f32 %v2254_v27, %v741_v45 }
 0x19f   : > { %782 = vst.msk [vmem:[#allocation3 + $0x18] sm:$0xff] %vm778_vm12, %v773_v46  ;;  %v772_v48 = vmax.f32 %v742_v47, 0.0 }
 0x1a1   : > { %781 = vst.msk [vmem:[#allocation3 + $0x10] sm:$0xff] %vm778_vm12, %v772_v48 }
 0x1a6   : > { %v799_v49 = vld [vmem:[#allocation3 + $0x19] sm:$0xf] }
 0x1a7   : > { %v791_v50 = vld [vmem:[#allocation3 + $0x18] sm:$0xf]  ;;  %810 = vrot.lane.b32.xlu0 %v799_v49, %s1963_s29 }
 0x1a8   : > { %795 = vst.msk [vmem:[#allocation4 + $0x18] sm:$0xf] %vm786_vm14, %v791_v50  ;;  %v823_v51 = vld [vmem:[#allocation3 + $0xa] sm:$0xff]  ;;  %v824_v56 = vld [vmem:[#allocation3 + $0x12] sm:$0xff]  ;;  %v825_v62 = vld [vmem:[#allocation3 + $0x1a] sm:$0xf] }
 0x1a9   : > { %832 = vrot.lane.b32.xlu1 %v823_v51, %s1962_s28  ;;  %v790_v52 = vld [vmem:[#allocation3 + $0x10] sm:$0xff]  ;;  %v1151_v51 = vld [vmem:[#allocation12 + $0x58] sm:$0xff] }
 0x1aa   : > { %v797_v53 = vld [vmem:[#allocation3 + $0x9] sm:$0xff]  ;;  %794 = vst.msk [vmem:[#allocation4 + $0x10] sm:$0xff] %vm778_vm12, %v790_v52  ;;  %v1681_v54 = vpop.f32.mrf.mxu1  ;;  %v798_v60 = vld [vmem:[#allocation3 + $0x11] sm:$0xff]  ;;  %1730 = vmatprep.subr.mxu0 %v1151_v51 }
 0x1ab   : > { %806 = vrot.lane.b32.xlu0 %v797_v53, %s1963_s29  ;;  %v757_v55 = vadd.f32 %v1681_v54, %v2254_v27 }
 0x1ac   : > { %v751_v57 = vpop.f32.mrf.mxu1 }
 0x1ad   : > { %834 = vrot.lane.b32.xlu1 %v824_v56, %s1962_s28  ;;  %v775_v58 = vmax.f32 %v757_v55, 0.0  ;;  %v752_v59 = vadd.f32 %v2254_v27, %v751_v57  ;;  %v1150_v57 = vld [vmem:[#allocation12 + $0x50] sm:$0xff] }
 0x1af   : > { %808 = vrot.lane.b32.xlu0 %v798_v60, %s1963_s29  ;;  %784 = vst.msk [vmem:[#allocation3 + $0x28] sm:$0xff] %vm778_vm12, %v775_v58  ;;  %v774_v61 = vmax.f32 %v752_v59, 0.0  ;;  %v1149_v58 = vld [vmem:[#allocation12 + $0x48] sm:$0xff]  ;;  %v1148_v59 = vld [vmem:[#allocation12 + $0x40] sm:$0xff] }
 0x1b1   : > { %783 = vst.msk [vmem:[#allocation3 + $0x20] sm:$0xff] %vm778_vm12, %v774_v61 }
 0x1b3   : > { %836 = vrot.lane.b32.xlu0 %v825_v62, %s1962_s28  ;;  %v1684_v63 = vpop.f32.mrf.mxu1 }
 0x1b4   : > { %v767_v0 = vadd.f32 %v1684_v63, %v2254_v27  ;;  %v1147_v63 = vld [vmem:[#allocation12 + $0x38] sm:$0xff] }
 0x1b5   : > { %v761_v1 = vpop.f32.mrf.mxu1 }
 0x1b6   : > { %v777_v2 = vmax.f32 %v767_v0, 0.0  ;;  %v762_v3 = vadd.f32 %v2254_v27, %v761_v1  ;;  %v881_v10 = vld [vmem:[#allocation3 + $0x28] sm:$0xff]  ;;  %v1146_v0 = vld [vmem:[#allocation12 + $0x30] sm:$0xff] }
 0x1b8   : > { %787 = vst.msk [vmem:[#allocation3 + $0x38] sm:$0xf] %vm786_vm14, %v777_v2  ;;  %v776_v4 = vmax.f32 %v762_v3, 0.0  ;;  %v856_v5 = vld [vmem:[#allocation3 + $0x1f] sm:$0xff]  ;;  %v857_v6 = vld [vmem:[#allocation3 + $0x27] sm:$0xff] }
 0x1b9   : > { %864 = vrot.lane.b32.xlu1 %v856_v5, %s1963_s29  ;;  %866 = vrot.lane.b32.xlu0 %v857_v6, %s1963_s29  ;;  %v848_v7 = vld [vmem:[#allocation3 + $0x1e] sm:$0xff]  ;;  %v849_v8 = vld [vmem:[#allocation3 + $0x26] sm:$0xff] }
 0x1ba   : > { %785 = vst.msk [vmem:[#allocation3 + $0x30] sm:$0xff] %vm778_vm12, %v776_v4  ;;  %852 = vst.msk [vmem:[#allocation4 + $0x1c] sm:$0xff] %vm778_vm12, %v848_v7  ;;  %v880_v9 = vld [vmem:[#allocation3 + $0x20] sm:$0xff]  ;;  %v1145_v3 = vld [vmem:[#allocation12 + $0x28] sm:$0xff] }
 0x1bb   : > { %853 = vst.msk [vmem:[#allocation4 + $0x24] sm:$0xff] %vm778_vm12, %v849_v8 }
 0x1bd   : > { %888 = vrot.lane.b32.xlu1 %v880_v9, %s1962_s28  ;;  %v1144_v9 = vld [vmem:[#allocation12 + $0x20] sm:$0xff] }
 0x1bf   : > { %v883_v16 = vld [vmem:[#allocation3 + $0x38] sm:$0xf] }
 0x1c1   : > { %890 = vrot.lane.b32.xlu1 %v881_v10, %s1962_s28  ;;  %v858_v11 = vld [vmem:[#allocation3 + $0x2f] sm:$0xff]  ;;  %v859_v15 = vld [vmem:[#allocation3 + $0x37] sm:$0xf] }
 0x1c2   : > { %868 = vrot.lane.b32.xlu0 %v858_v11, %s1963_s29  ;;  %v850_v12 = vld [vmem:[#allocation3 + $0x2e] sm:$0xff]  ;;  %v851_v13 = vld [vmem:[#allocation3 + $0x36] sm:$0xf] }
 0x1c3   : > { %854 = vst.msk [vmem:[#allocation4 + $0x2c] sm:$0xff] %vm778_vm12, %v850_v12  ;;  %v882_v14 = vld [vmem:[#allocation3 + $0x30] sm:$0xff]  ;;  %v1143_v10 = vld [vmem:[#allocation12 + $0x18] sm:$0xff] }
 0x1c4   : > { %855 = vst.msk [vmem:[#allocation4 + $0x34] sm:$0xf] %vm786_vm14, %v851_v13  ;;  %vm1296_vm14 = vcmask 1048070  }
 0x1c5   : > { %892 = vrot.lane.b32.xlu1 %v882_v14, %s1962_s28 }
 0x1c6   : > { %870 = vrot.lane.b32.xlu0 %v859_v15, %s1963_s29 }
 0x1c9   : > { %894 = vrot.lane.b32.xlu1 %v883_v16, %s1962_s28 }
 0x207   : > { %v831_v17 = vpop.permute.xlu1 %830 }
 0x208   : > { %v805_v18 = vpop.permute.xlu0 %804 }
 0x209   : > { %817 = vst.msk [vmem:[#allocation4] sm:$0xff] %vm816_vm15, %v805_v18 }
 0x20a   : > { %843 = vst.msk [vmem:[#allocation4] sm:$0xff] %vm842_vm0, %v831_v17 }
 0x211   : > { %v904_v19 = vld [vmem:[#allocation4] sm:$0xff] }
 0x212   : > { %1710 = vmatmul.mubr.msk.f32.vlgmr.msra.gmra.mxu0 %vm930_vm1, %v904_v19  ;;  %v1142_v19 = vld [vmem:[#allocation12 + $0x10] sm:$0xff] }
 0x213   : > { %1712 = vmatprep.mubr.msk.f32.mxu0 %vm1961_vm13, %v1960_v20  ;;  %1731 = vmatpush3.msra.mxu0 %v1151_v51  ;;  %v1318_v51 = vld [vmem:[%s2526_s7 + $0x38] sm:$0xff] }
 0x214   : > { %1732 = vmatprep.subr.mxu0 %v1150_v57 }
 0x215   : > { %1733 = vmatpush3.msra.mxu0 %v1150_v57  ;;  %v1312_v57 = vld [vmem:[%s2526_s7 + $0x8] sm:$0xff] }
 0x216   : > { %1734 = vmatprep.subr.mxu0 %v1149_v58 }
 0x217   : > { %1735 = vmatpush3.msra.mxu0 %v1149_v58  ;;  %v1311_v58 = vld [vmem:[%s2526_s7] sm:$0xff] }
 0x218   : > { %1736 = vmatprep.subr.mxu0 %v1148_v59 }
 0x219   : > { %v811_v21 = vpop.permute.xlu0 %810  ;;  %1737 = vmatpush3.msra.mxu0 %v1148_v59  ;;  %v1608_v59 = vld [vmem:[%s2525_s6] ss:$0 sm:$0xff] }
 0x21a   : > { %821 = vst.msk [vmem:[#allocation4 + $0x18] sm:$0xf] %vm820_vm3, %v811_v21  ;;  %1738 = vmatprep.subr.mxu0 %v1147_v63 }
 0x21b   : > { %v833_v22 = vpop.permute.xlu1 %832  ;;  %1739 = vmatpush3.msra.mxu0 %v1147_v63  ;;  %v1334_v63 = vld [vmem:[%s2526_s7 + $0xb8] sm:$0xff] }
 0x21c   : > { %1740 = vmatprep.subr.mxu0 %v1146_v0 }
 0x21d   : > { %v807_v23 = vpop.permute.xlu0 %806  ;;  %1741 = vmatpush3.msra.mxu0 %v1146_v0  ;;  %v1333_v0 = vld [vmem:[%s2526_s7 + $0xb0] sm:$0xff] }
 0x21e   : > { %818 = vst.msk [vmem:[#allocation4 + $0x8] sm:$0xff] %vm816_vm15, %v807_v23  ;;  %1742 = vmatprep.subr.mxu0 %v1145_v3  ;;  %v1141_v23 = vld [vmem:[#allocation12 + $0x8] sm:$0xff] }
 0x21f   : > { %844 = vst.msk [vmem:[#allocation4 + $0x8] sm:$0xff] %vm842_vm0, %v833_v22  ;;  %v835_v25 = vpop.permute.xlu1 %834  ;;  %1743 = vmatpush3.msra.mxu0 %v1145_v3  ;;  %v1332_v3 = vld [vmem:[%s2526_s7 + $0xa8] sm:$0xff] }
 0x220   : > { %1744 = vmatprep.subr.mxu0 %v1144_v9 }
 0x221   : > { %v809_v24 = vpop.permute.xlu0 %808  ;;  %1745 = vmatpush3.msra.mxu0 %v1144_v9 }
 0x222   : > { %819 = vst.msk [vmem:[#allocation4 + $0x10] sm:$0xff] %vm816_vm15, %v809_v24  ;;  %1746 = vmatprep.subr.mxu0 %v1143_v10  ;;  %v1140_v24 = vld [vmem:[#allocation12] sm:$0xff] }
 0x223   : > { %845 = vst.msk [vmem:[#allocation4 + $0x10] sm:$0xff] %vm842_vm0, %v835_v25  ;;  %1747 = vmatpush3.msra.mxu0 %v1143_v10 }
 0x224   : > { %1748 = vmatprep.subr.mxu0 %v1142_v19 }
 0x225   : > { %v837_v26 = vpop.permute.xlu0 %836  ;;  %1749 = vmatpush3.msra.mxu0 %v1142_v19 }
 0x226   : > { %847 = vst.msk [vmem:[#allocation4 + $0x18] sm:$0xf] %vm846_vm4, %v837_v26  ;;  %v905_v27 = vld [vmem:[#allocation4 + $0x8] sm:$0xff]  ;;  %1750 = vmatprep.subr.mxu0 %v1141_v23 }
 0x227   : > { %1713 = vmatmul.mubr.msk.f32.gmra.mxu0 %vm930_vm1, %v905_v27 }
 0x228   : > { %1715 = vmatprep.mubr.msk.f32.mxu0 %vm1961_vm13, %v1960_v20  ;;  %1751 = vmatpush3.msra.mxu0 %v1141_v23 }
 0x229   : > { %1752 = vmatprep.subr.mxu0 %v1140_v24 }
 0x22a   : > { %v906_v28 = vld [vmem:[#allocation4 + $0x10] sm:$0xff]  ;;  %1753 = vmatpush3.msra.mxu0 %v1140_v24 }
 0x22b   : > { %1716 = vmatmul.mubr.msk.f32.gmra.mxu0 %vm930_vm1, %v906_v28  ;;  %v865_v29 = vpop.permute.xlu1 %864  ;;  %v867_v30 = vpop.permute.xlu0 %866 }
 0x22c   : > { %1718 = vmatprep.mubr.msk.f32.mxu0 %vm1961_vm13, %v1960_v20  ;;  %876 = vst.msk [vmem:[#allocation4 + $0x1c] sm:$0xff] %vm816_vm15, %v865_v29  ;;  %877 = vst.msk [vmem:[#allocation4 + $0x24] sm:$0xff] %vm816_vm15, %v867_v30 }
 0x22f   : > { %v889_v31 = vpop.permute.xlu1 %888 }
 0x230   : > { %900 = vst.msk [vmem:[#allocation4 + $0x1c] sm:$0xff] %vm842_vm0, %v889_v31 }
 0x233   : > { %v891_v32 = vpop.permute.xlu1 %890 }
 0x234   : > { %901 = vst.msk [vmem:[#allocation4 + $0x24] sm:$0xff] %vm842_vm0, %v891_v32  ;;  %v869_v33 = vpop.permute.xlu0 %868 }
 0x235   : > { %878 = vst.msk [vmem:[#allocation4 + $0x2c] sm:$0xff] %vm816_vm15, %v869_v33 }
 0x237   : > { %v893_v34 = vpop.permute.xlu1 %892  ;;  %v907_v35 = vld [vmem:[#allocation4 + $0x18] sm:$0xff] }
 0x238   : > { %902 = vst.msk [vmem:[#allocation4 + $0x2c] sm:$0xff] %vm842_vm0, %v893_v34  ;;  %v871_v36 = vpop.permute.xlu0 %870  ;;  %1719 = vmatmul.mubr.msk.f32.gmra.mxu0 %vm930_vm1, %v907_v35 }
 0x239   : > { %879 = vst.msk [vmem:[#allocation4 + $0x34] sm:$0xf] %vm820_vm3, %v871_v36  ;;  %1721 = vmatprep.mubr.msk.f32.mxu0 %vm1961_vm13, %v1960_v20 }
 0x23b   : > { %v895_v37 = vpop.permute.xlu1 %894  ;;  %v908_v38 = vld [vmem:[#allocation4 + $0x20] sm:$0xff] }
 0x23c   : > { %903 = vst.msk [vmem:[#allocation4 + $0x34] sm:$0xf] %vm846_vm4, %v895_v37  ;;  %1722 = vmatmul.mubr.msk.f32.gmra.mxu0 %vm930_vm1, %v908_v38 }
 0x23d   : > { %1724 = vmatprep.mubr.msk.f32.mxu0 %vm1961_vm13, %v1960_v20 }
 0x23f   : > { %v909_v39 = vld [vmem:[#allocation4 + $0x28] sm:$0xff] }
 0x240   : > { %1725 = vmatmul.mubr.msk.f32.gmra.mxu0 %vm930_vm1, %v909_v39 }
 0x241   : > { %1727 = vmatprep.mubr.msk.f32.mxu0 %vm1961_vm13, %v1960_v20  ;;  %vm1275_vm13 = vcmask 1046016  }
 0x243   : > { %v910_v40 = vld [vmem:[#allocation4 + $0x30] sm:$0xff] }
 0x244   : > { %1728 = vmatmul.mubr.msk.f32.gmra.mxu0 %vm930_vm1, %v910_v40 }
 0x2d2   : > { %v1018_v42 = vpop.f32.mrf.mxu0 }
 0x2d3   : > { %v1019_v43 = vadd.f32 %v2340_v41, %v1018_v42 }
 0x2d4   : > { %v1711_v44 = vpop.f32.mrf.mxu0 }
 0x2d5   : > { %v1052_v45 = vmax.f32 %v1019_v43, 0.0  ;;  %v1326_v43 = vld [vmem:[%s2526_s7 + $0x78] sm:$0xff]  ;;  %v1325_v44 = vld [vmem:[%s2526_s7 + $0x70] sm:$0xff] }
 0x2d6   : > { %1349 = vmatpush1.msra.mxu1 %v1326_v43 }
 0x2d7   : > { %1059 = vst.msk [vmem:[#allocation5] sm:$0xff] %vm778_vm12, %v1052_v45  ;;  %1350 = vmatprep.subr.mxu1 %v1960_v20  ;;  %v1324_v45 = vld [vmem:[%s2526_s7 + $0x68] sm:$0xff] }
 0x2d8   : > { %1351 = vmatpush1.msra.mxu1 %v1325_v44 }
 0x2d9   : > { %1352 = vmatprep.subr.mxu1 %v1960_v20 }
 0x2da   : > { %1353 = vmatpush1.msra.mxu1 %v1324_v45 }
 0x2db   : > { %1354 = vmatprep.subr.mxu1 %v1960_v20 }
 0x2e7   : > { %v1023_v46 = vpop.f32.mrf.mxu0 }
 0x2e8   : > { %v1024_v47 = vadd.f32 %v2340_v41, %v1023_v46  ;;  %v1323_v46 = vld [vmem:[%s2526_s7 + $0x60] sm:$0xff] }
 0x2e9   : > { %v1714_v48 = vpop.f32.mrf.mxu0  ;;  %1355 = vmatpush1.msra.mxu1 %v1323_v46 }
 0x2ea   : > { %v1053_v49 = vmax.f32 %v1024_v47, 0.0  ;;  %v1322_v47 = vld [vmem:[%s2526_s7 + $0x58] sm:$0xff]  ;;  %1356 = vmatprep.subr.mxu1 %v1960_v20  ;;  %v1321_v48 = vld [vmem:[%s2526_s7 + $0x50] sm:$0xff] }
 0x2eb   : > { %v1028_v50 = vpop.f32.mrf.mxu0  ;;  %1357 = vmatpush1.msra.mxu1 %v1322_v47 }
 0x2ec   : > { %1060 = vst.msk [vmem:[#allocation5 + $0x8] sm:$0xff] %vm778_vm12, %v1053_v49  ;;  %v1029_v52 = vadd.f32 %v2340_v41, %v1028_v50  ;;  %1358 = vmatprep.subr.mxu1 %v1960_v20  ;;  %v1320_v49 = vld [vmem:[%s2526_s7 + $0x48] sm:$0xff]  ;;  %v1319_v50 = vld [vmem:[%s2526_s7 + $0x40] sm:$0xff] }
 0x2ed   : > { %v1717_v53 = vpop.f32.mrf.mxu0  ;;  %1359 = vmatpush1.msra.mxu1 %v1321_v48 }
 0x2ee   : > { %v1054_v54 = vmax.f32 %v1029_v52, 0.0  ;;  %1360 = vmatprep.subr.mxu1 %v1960_v20  ;;  %v1317_v52 = vld [vmem:[%s2526_s7 + $0x30] sm:$0xff]  ;;  %v1316_v53 = vld [vmem:[%s2526_s7 + $0x28] sm:$0xff] }
 0x2ef   : > { %1361 = vmatpush1.msra.mxu1 %v1320_v49 }
 0x2f0   : > { %1061 = vst.msk [vmem:[#allocation5 + $0x10] sm:$0xff] %vm778_vm12, %v1054_v54  ;;  %1362 = vmatprep.subr.mxu1 %v1960_v20  ;;  %v1315_v54 = vld [vmem:[%s2526_s7 + $0x20] sm:$0xff] }
 0x2f1   : > { %1363 = vmatpush1.msra.mxu1 %v1319_v50 }
 0x2f2   : > { %1364 = vmatprep.subr.mxu1 %v1960_v20 }
 0x2f3   : > { %v1073_v55 = vld [vmem:[#allocation5 + $0x1] ss:$2 sm:$0xff]  ;;  %v1066_v56 = vld [vmem:[#allocation5] ss:$2 sm:$0xff]  ;;  %1365 = vmatpush1.msra.mxu1 %v1318_v51 }
 0x2f4   : > { %1078 = vrot.lane.b32.xlu0 %v1073_v55, %s1963_s29  ;;  %1069 = vst.msk [vmem:[#allocation6] sm:$0xff] %vm778_vm12, %v1066_v56  ;;  %1366 = vmatprep.subr.mxu1 %v1960_v20  ;;  %v1314_v55 = vld [vmem:[%s2526_s7 + $0x18] sm:$0xff]  ;;  %v1313_v56 = vld [vmem:[%s2526_s7 + $0x10] sm:$0xff] }
 0x2f5   : > { %1367 = vmatpush1.msra.mxu1 %v1317_v52 }
 0x2f6   : > { %1368 = vmatprep.subr.mxu1 %v1960_v20 }
 0x2f7   : > { %v1088_v60 = vld [vmem:[#allocation5 + $0x2] ss:$2 sm:$0xff]  ;;  %1369 = vmatpush1.msra.mxu1 %v1316_v53 }
 0x2f8   : > { %1093 = vrot.lane.b32.xlu0 %v1088_v60, %s1962_s28  ;;  %v1033_v61 = vpop.f32.mrf.mxu0  ;;  %1370 = vmatprep.subr.mxu1 %v1960_v20 }
 0x2f9   : > { %v1034_v62 = vadd.f32 %v2340_v41, %v1033_v61  ;;  %1371 = vmatpush1.msra.mxu1 %v1315_v54 }
 0x2fa   : > { %v1720_v1 = vpop.f32.mrf.mxu0  ;;  %1372 = vmatprep.subr.mxu1 %v1960_v20 }
 0x2fb   : > { %v1055_v2 = vmax.f32 %v1034_v62, 0.0  ;;  %1373 = vmatpush1.msra.mxu1 %v1314_v55 }
 0x2fc   : > { %v1038_v4 = vpop.f32.mrf.mxu0  ;;  %1374 = vmatprep.subr.mxu1 %v1960_v20 }
 0x2fd   : > { %1062 = vst.msk [vmem:[#allocation5 + $0x18] sm:$0xff] %vm778_vm12, %v1055_v2  ;;  %v1039_v5 = vadd.f32 %v2340_v41, %v1038_v4  ;;  %1375 = vmatpush1.msra.mxu1 %v1313_v56 }
 0x2fe   : > { %v1723_v6 = vpop.f32.mrf.mxu0  ;;  %1376 = vmatprep.subr.mxu1 %v1960_v20 }
 0x2ff   : > { %v1056_v7 = vmax.f32 %v1039_v5, 0.0  ;;  %1377 = vmatpush1.msra.mxu1 %v1312_v57 }
 0x300   : > { %v1043_v8 = vpop.f32.mrf.mxu0  ;;  %1378 = vmatprep.subr.mxu1 %v1960_v20 }
 0x301   : > { %1063 = vst.msk [vmem:[#allocation5 + $0x20] sm:$0xff] %vm778_vm12, %v1056_v7  ;;  %v1044_v11 = vadd.f32 %v2340_v41, %v1043_v8  ;;  %1379 = vmatpush1.msra.mxu1 %v1311_v58  ;;  %v1331_v7 = vld [vmem:[%s2526_s7 + $0xa0] sm:$0xff] }
 0x302   : > { %v1726_v12 = vpop.f32.mrf.mxu0  ;;  %1396 = vmatprep.subr.mxu1 %v1960_v20 }
 0x303   : > { %v1057_v13 = vmax.f32 %v1044_v11, 0.0  ;;  %1397 = vmatpush2.msra.mxu1 %v1334_v63  ;;  %v1330_v11 = vld [vmem:[%s2526_s7 + $0x98] sm:$0xff] }
 0x304   : > { %v1048_v14 = vpop.f32.mrf.mxu0  ;;  %v1090_v15 = vld [vmem:[#allocation5 + $0x12] ss:$2 sm:$0x1f]  ;;  %v1075_v16 = vld [vmem:[#allocation5 + $0x11] ss:$2 sm:$0x1f]  ;;  %1398 = vmatprep.subr.mxu1 %v1960_v20 }
 0x305   : > { %1064 = vst.msk [vmem:[#allocation5 + $0x28] sm:$0xff] %vm778_vm12, %v1057_v13  ;;  %v1049_v17 = vadd.f32 %v2340_v41, %v1048_v14  ;;  %1095 = vrot.lane.b32.xlu0 %v1090_v15, %s1962_s28  ;;  %1080 = vrot.lane.b32.xlu1 %v1075_v16, %s1963_s29  ;;  %v1068_v18 = vld [vmem:[#allocation5 + $0x10] ss:$2 sm:$0x1f]  ;;  %v1327_v15 = vld [vmem:[%s2526_s7 + $0x80] sm:$0xff] }
 0x306   : > { %v1729_v21 = vpop.f32.mrf.mxu0  ;;  %1071 = vst.msk [vmem:[#allocation6 + $0x8] sm:$0x1f] %vm1070_vm5, %v1068_v18  ;;  %1399 = vmatpush2.msra.mxu1 %v1333_v0  ;;  %v1329_v13 = vld [vmem:[%s2526_s7 + $0x90] sm:$0xff]  ;;  %v1328_v14 = vld [vmem:[%s2526_s7 + $0x88] sm:$0xff] }
 0x307   : > { %v1058_v22 = vmax.f32 %v1049_v17, 0.0  ;;  %1400 = vmatprep.subr.mxu1 %v1960_v20 }
 0x308   : > { %1401 = vmatpush2.msra.mxu1 %v1332_v3 }
 0x309   : > { %1065 = vst.msk [vmem:[#allocation5 + $0x30] sm:$0xff] %vm778_vm12, %v1058_v22  ;;  %1402 = vmatprep.subr.mxu1 %v1960_v20 }
 0x30a   : > { %1403 = vmatpush2.msra.mxu1 %v1331_v7 }
 0x30b   : > { %1404 = vmatprep.subr.mxu1 %v1960_v20 }
 0x30c   : > { %v1109_v25 = vld [vmem:[#allocation5 + $0x1d] ss:$2 sm:$0xff]  ;;  %v1103_v26 = vld [vmem:[#allocation5 + $0x1c] ss:$2 sm:$0xff]  ;;  %1405 = vmatpush2.msra.mxu1 %v1330_v11 }
 0x30d   : > { %1114 = vrot.lane.b32.xlu1 %v1109_v25, %s1963_s29  ;;  %1106 = vst.msk [vmem:[#allocation6 + $0xd] sm:$0xff] %vm778_vm12, %v1103_v26  ;;  %v1123_v27 = vld [vmem:[#allocation5 + $0x1e] ss:$2 sm:$0xff]  ;;  %1406 = vmatprep.subr.mxu1 %v1960_v20  ;;  %vm1287_vm12 = vcmask 519168  }
 0x30e   : > { %1407 = vmatpush2.msra.mxu1 %v1329_v13 }
 0x30f   : > { %1408 = vmatprep.subr.mxu1 %v1960_v20 }
 0x310   : > { %v1111_v28 = vld [vmem:[#allocation5 + $0x2d] ss:$2 sm:$0x1f]  ;;  %v1105_v29 = vld [vmem:[#allocation5 + $0x2c] ss:$2 sm:$0x1f]  ;;  %1409 = vmatpush2.msra.mxu1 %v1328_v14 }
 0x311   : > { %1128 = vrot.lane.b32.xlu1 %v1123_v27, %s1962_s28  ;;  %1116 = vrot.lane.b32.xlu0 %v1111_v28, %s1963_s29  ;;  %1107 = vst.msk [vmem:[#allocation6 + $0x15] sm:$0x1f] %vm1070_vm5, %v1105_v29  ;;  %v1125_v30 = vld [vmem:[#allocation5 + $0x2e] ss:$2 sm:$0x1f]  ;;  %s1548_s29 = sshll.u32 %s353_s27, 1 }
 0x312   : > { %1410 = vmatprep.subr.mxu1 %v1960_v20  ;;  %s355_s14 = scalar_lea.vmem [#allocation14], %s1548_s29 }
 0x313   : > { %1411 = vmatpush2.msra.mxu1 %v1327_v15  ;;  %s1459_s17 = sshll.u32 %s355_s14, 4  ;;  %s1460_s17 = int_to_ptr.vmem [resolvable:$true] %s1459_s17 }
 0x314   : > { %s1882_s26 = scalar_lea.vmem %s1460_s17, 32 }
 0x315   : > { %1130 = vrot.lane.b32.xlu1 %v1125_v30, %s1962_s28  ;;  %p1883_p10 = scmp.ne.s32.totalorder %s1460_s17, %s1882_s26 }
 0x317   : > { %p1884_p12 = pnand %p1883_p10, %p2053_p5 }
 0x319   : > { %p1885_p8 = pneg %p1884_p12 }
 0x366   : > { %v1079_v31 = vpop.permute.xlu0 %1078 }
 0x367   : > { %1084 = vst.msk [vmem:[#allocation6] sm:$0xff] %vm816_vm15, %v1079_v31  ;;  %v1613_v31 = vld [vmem:[%s2527_s8] ss:$0 sm:$0xff] }
 0x36a   : > { %v1094_v32 = vpop.permute.xlu0 %1093 }
 0x36b   : > { %1099 = vst.msk [vmem:[#allocation6] sm:$0xff] %vm842_vm0, %v1094_v32 }
 0x372   : > { %v1136_v33 = vld [vmem:[#allocation6] sm:$0xff] }
 0x373   : > { %1754 = vmatprep.mubr.msk.f32.mxu0 %vm930_vm1, %v1136_v33 }
 0x377   : > { %v1096_v34 = vpop.permute.xlu0 %1095  ;;  %v1081_v35 = vpop.permute.xlu1 %1080 }
 0x378   : > { %1086 = vst.msk [vmem:[#allocation6 + $0x8] sm:$0x1f] %vm1085_vm6, %v1081_v35 }
 0x379   : > { %1101 = vst.msk [vmem:[#allocation6 + $0x8] sm:$0x1f] %vm1100_vm7, %v1096_v34 }
 0x37f   : > { %v1115_v36 = vpop.permute.xlu1 %1114 }
 0x380   : > { %1120 = vst.msk [vmem:[#allocation6 + $0xd] sm:$0xff] %vm816_vm15, %v1115_v36  ;;  %vm1298_vm15 = vcmask 1043968  }
 0x383   : > { %v1129_v37 = vpop.permute.xlu1 %1128  ;;  %v1117_v38 = vpop.permute.xlu0 %1116 }
 0x384   : > { %1134 = vst.msk [vmem:[#allocation6 + $0xd] sm:$0xff] %vm842_vm0, %v1129_v37  ;;  %vm1425_vm0 = vcmask 1045504  }
 0x385   : > { %1121 = vst.msk [vmem:[#allocation6 + $0x15] sm:$0x1f] %vm1085_vm6, %v1117_v38 }
 0x387   : > { %v1131_v39 = vpop.permute.xlu1 %1130 }
 0x388   : > { %1135 = vst.msk [vmem:[#allocation6 + $0x15] sm:$0x1f] %vm1100_vm7, %v1131_v39 }
 0x38b   : > { %v1137_v40 = vld [vmem:[#allocation6 + $0x8] sm:$0xff] }
 0x38c   : > { %1755 = vmatmul.mubr.msk.f32.vlgmr.msra.gmra.mxu0 %vm930_vm1, %v1137_v40 }
 0x38f   : > { %v1138_v41 = vld [vmem:[#allocation6 + $0x10] sm:$0xff]  ;;  %v1139_v42 = vld [vmem:[#allocation6 + $0x18] sm:$0x3] }
 0x390   : > { %1757 = vmatprep.mubr.msk.f32.mxu0 %vm930_vm1, %v1138_v41 }
 0x391   : > { %1758 = vmatmul.mubr.msk.f32.gmra.mxu0 %vm930_vm1, %v1139_v42  ;;  %vm1434_vm1 = vcmask 1047558  }
 0x44c   : > { %v1756_v60 = vpop.f32.mrf.mxu0 }
 0x44d   : > { %v1243_v61 = vadd.f32 %v1756_v60, %v1608_v59 }
 0x44e   : > { %v1237_v62 = vpop.f32.mrf.mxu0 }
 0x44f   : > { %v1257_v1 = vmax.f32 %v1243_v61, 0.0  ;;  %v1238_v2 = vadd.f32 %v1608_v59, %v1237_v62 }
 0x451   : > { %1262 = vst.msk [vmem:[#allocation7 + $0x8] sm:$0xff] %vm1260_vm8, %v1257_v1  ;;  %v1256_v4 = vmax.f32 %v1238_v2, 0.0  ;;  %v1759_v5 = vpop.f32.mrf.mxu0 }
 0x452   : > { %v1253_v6 = vadd.f32 %v1759_v5, %v1608_v59 }
 0x453   : > { %1261 = vst.msk [vmem:[#allocation7] sm:$0xff] %vm1260_vm8, %v1256_v4  ;;  %v1247_v8 = vpop.f32.mrf.mxu0 }
 0x454   : > { %v1259_v9 = vmax.f32 %v1253_v6, 0.0  ;;  %v1248_v10 = vadd.f32 %v1608_v59, %v1247_v8 }
 0x456   : > { %1265 = vst.msk [vmem:[#allocation7 + $0x18] sm:$0x3] %vm1264_vm9, %v1259_v9  ;;  %v1258_v12 = vmax.f32 %v1248_v10, 0.0 }
 0x458   : > { %1263 = vst.msk [vmem:[#allocation7 + $0x10] sm:$0xff] %vm1260_vm8, %v1258_v12 }
 0x45a   : > { %v1278_v16 = vld [vmem:[#allocation7 + $0x2] ss:$2 sm:$0x3f]  ;;  %v1270_v17 = vld [vmem:[#allocation7 + $0x1] ss:$2 sm:$0x3f] }
 0x45b   : > { %1272 = vrot.lane.b32.xlu0 %v1270_v17, %s1962_s28  ;;  %1279 = vst.msk [vmem:[#allocation8 + $0x8] sm:$0x3f] %vm1267_vm10, %v1278_v16  ;;  %v1266_v18 = vld [vmem:[#allocation7] ss:$2 sm:$0x3f] }
 0x45c   : > { %1268 = vst.msk [vmem:[#allocation8] sm:$0x3f] %vm1267_vm10, %v1266_v18 }
 0x45f   : > { %v1301_v19 = vld [vmem:[#allocation7 + $0xf] ss:$2 sm:$0x3f]  ;;  %v1290_v21 = vld [vmem:[#allocation7 + $0xe] ss:$2 sm:$0x3f] }
 0x460   : > { %v1303_v22 = vrot.slane %v1301_v19, 2  ;;  %v1292_v23 = vrot.slane %v1290_v21, 2  ;;  %v1281_v24 = vld [vmem:[#allocation7 + $0xd] ss:$2 sm:$0x3f] }
 0x461   : > { %v1283_v25 = vrot.slane %v1281_v24, 2 }
 0x462   : > { %1293 = vrot.lane.b32.xlu1 %v1292_v23, %s1962_s28  ;;  %1305 = vst.msk [vmem:[#allocation8 + $0x8] sm:$0xc0] %vm1285_vm11, %v1303_v22  ;;  %s1964_s28 = smov [#allocation14]  }
 0x463   : > { %1306 = vst.msk [vmem:[#allocation8 + $0x18] sm:$0xf] %vm1287_vm12, %v1303_v22  ;;  %1288 = vst.msk [vmem:[#allocation8 + $0x10] sm:$0xf] %vm1287_vm12, %v1283_v25  ;;  %s1886_s21 = sshll.u32 %s1964_s28, 4  ;;  %s1887_s21 = int_to_ptr.vmem [resolvable:$false] %s1886_s21 }
 0x464   : > { %1286 = vst.msk [vmem:[#allocation8] sm:$0xc0] %vm1285_vm11, %v1283_v25  ;;  %s1888_s29 = scalar_lea.vmem %s1887_s21, 64  ;;  %p1889_p11 = scmp.lt.s32.totalorder %s1460_s17, %s1887_s21 }
 0x465   : > { %p1890_p0 = scmp.lt.s32.totalorder %s1888_s29, %s1882_s26 }
 0x467   : > { %p1891_p1 = por %p1890_p0, %p1889_p11 }
 0x469   : > { %v1308_v26 = vld [vmem:[#allocation8 + $0x8] sm:$0xff]  ;;  %p1892_p3 = pnand %p1891_p1, %p1885_p8 }
 0x46a   : > { %1614 = vmatprep.mubr.msk.f32.mxu1 %vm1260_vm8, %v1308_v26  ;;  %v1310_v29 = vld [vmem:[#allocation8 + $0x18] sm:$0xf] }
 0x4cd   : > { %v1273_v20 = vpop.permute.xlu0 %1272 }
 0x4ce   : > { %1276 = vst.msk [vmem:[#allocation8] sm:$0x3f] %vm1275_vm13, %v1273_v20 }
 0x4d4   : > { %v1294_v27 = vpop.permute.xlu1 %1293 }
 0x4d5   : > { %1297 = vst.msk [vmem:[#allocation8] sm:$0xc0] %vm1296_vm14, %v1294_v27 }
 0x4d6   : > { %1299 = vst.msk [vmem:[#allocation8 + $0x10] sm:$0xf] %vm1298_vm15, %v1294_v27 }
 0x4dc   : > { %v1307_v28 = vld [vmem:[#allocation8] sm:$0xff] }
 0x4dd   : > { %1413 = vmatmul.mubr.f32.vlgmr.msra.gmra.mxu1 %v1307_v28  ;;  %v1309_v30 = vld [vmem:[#allocation8 + $0x10] sm:$0xf] }
 0x4de   : > { %1615 = vmatprep.mubr.msk.f32.mxu1 %vm1260_vm8, %v1310_v29 }
 0x4e1   : > { %1418 = vmatmul.mubr.f32.gmra.mxu1 %v1309_v30 }
 0x59d   : > { %v1414_v32 = vpop.f32.mrf.mxu1 }
 0x59e   : > { %v1415_v33 = vadd.f32 %v1613_v31, %v1414_v32 }
 0x59f   : > { %v1416_v34 = vpop.f32.mrf.mxu1 }
 0x5a0   : > { %v1423_v35 = vmax.f32 %v1415_v33, 0.0 }
 0x5a1   : > { %v1419_v36 = vpop.f32.mrf.mxu1 }
 0x5a2   : > { %v1426_v37 = vsel %vm1425_vm0, %v1423_v35, -inf  ;;  %v1420_v38 = vadd.f32 %v1613_v31, %v1419_v36  ;;  %v1435_v43 = vsel %vm1434_vm1, %v1423_v35, -inf }
 0x5a3   : > { %v1427_v39 = vrot.slane %v1426_v37, 4  ;;  %v1421_v40 = vpop.f32.mrf.mxu1 }
 0x5a4   : > { %v1424_v41 = vmax.f32 %v1420_v38, 0.0 }
 0x5a5   : > { %v1428_v42 = vmax.f32 %v1426_v37, %v1427_v39 }
 0x5a6   : > { %v1436_v44 = vsel %vm661_vm2, %v1424_v41, -inf }
 0x5a7   : > { %v1429_v45 = vrot.slane %v1428_v42, 2  ;;  %v1437_v46 = vmax.f32 %v1435_v43, %v1436_v44 }
 0x5a9   : > { %v1430_v47 = vmax.f32 %v1428_v42, %v1429_v45  ;;  %v1438_v48 = vrot.slane %v1437_v46, 4 }
 0x5ab   : > { %v1431_v49 = vrot.slane %v1430_v47, 1  ;;  %v1439_v50 = vmax.f32 %v1437_v46, %v1438_v48 }
 0x5ad   : > { %v1432_v51 = vmax.f32 %v1430_v47, %v1431_v49  ;;  %v1440_v52 = vrot.slane %v1439_v50, 2 }
 0x5af   : > { %v1441_v53 = vmax.f32 %v1439_v50, %v1440_v52  ;;  %1433 = vst [vmem:[%s355_s14] sm:$0x1] %v1432_v51 }
 0x5b1   : > { %v1442_v54 = vrot.slane %v1441_v53, 1 }
 0x5b3   : > { %v1443_v55 = vmax.f32 %v1441_v53, %v1442_v54 }
 0x5b5   : > { %1444 = vst [vmem:[%s355_s14 + $0x1] sm:$0x1] %v1443_v55 }
 0x5b6   : > { %1895 = shalt.err (!%p1892_p3)
}
 0x5b7   : > { %s1896_s13 = scalar_lea.hbm %s1457_s23, 32  ;;  %s1900_s16 = scalar_lea.hbm %s2528_s9, 64 }
 0x5b8   : > { %p1897_p2 = scmp.ne.s32.totalorder %s1457_s23, %s1896_s13  ;;  %p1901_p7 = scmp.lt.s32.totalorder %s1457_s23, %s2528_s9 }
 0x5b9   : > { %p1902_p6 = scmp.lt.s32.totalorder %s1900_s16, %s1896_s13 }
 0x5ba   : > { %p1898_p4 = pnand %p1897_p2, %p2053_p5 }
 0x5bb   : > { %p1903_p9 = por %p1902_p6, %p1901_p7 }
 0x5bc   : > { %p1899_p13 = pneg %p1898_p4 }
 0x5be   : > { %p1904_p10 = pnand %p1903_p9, %p1899_p13 }
 0x5c0   : > { %1907 = shalt.err (!%p1904_p10)
}
 0x5c1   : > { %1768 = dma.vmem_to_hbm [thread:$0]  (%p2053_p5), %s1460_s17, 32, %s1457_s23, %s1446_s24  }
 0x5c2 PF: > { %p1785_p12 = scmp.ge.s32.totalorder %s1950_s12, 2  ;;  %s1471_s26 = sand.u32 1, %s1938_s30  }
 0x5c3   : > { %p2538_p8 = scmp.ne.s32.totalorder %s2531_s20, 0  ;;  %s1472_s28 = scalar_lea.sflag [#allocation11], %s1471_s26 }
 0x5c5   : > { %p1778_p11 = pnand %p1785_p12, %p2538_p8 }
 0x5c7   : > { %p1779_p0 = pneg %p1778_p11 }
 0x5c9   : > { %1933 = dma.done.wait (%p1779_p0), %s1472_s28, 32  }
 0x5ca   : > { %1935 = vsyncadd (%p1779_p0), %s1472_s28, 4294967264  ;;  %p21_p1 = scmp.ge.s32.totalorder %s2040_s15, 4   ;;  %s2539_s30 = smov %s1942_s10 }
 0x5cb   : > { %s2540_s10 = smov %s1946_s11  ;;  %s2541_s11 = smov %s2051_s18 }
 0x5cc   : > { %s2542_s12 = smov %s2040_s15  ;;  %23 = sbr.rel (!%p21_p1) target bundleno = 5 (0x5), region = 155 }
 0x5d1   :  { %1477 = vsyncpa [#allocation10], 1 }
 0x5d2   :  { %1479 = vsyncpa [#allocation10 + $0x1], 1 }
 0x5d3   :  { %1480 = vsyncpa [#allocation13], 1 }
 0x5d4   :  { %1481 = vsyncpa [#allocation11], 1 }
 0x5d5   :  { %1483 = vsyncpa [#allocation11 + $0x1], 1 }

</bundles_post_ra>
